<compile_context>
chip_gen: v7x
topology: tpu7x:2x2x1
jax: 0.10.0
libtpu: 0.0.40
codegen_flags: <defaults>
</compile_context>

<pallas_src>
import functools

import jax
import jax.numpy as jnp
from jax import lax
from jax.experimental import pallas as pl
from jax.experimental.pallas import tpu as pltpu


LANE = 128       # pad feature dims to full vreg lanes (unmasked stores)
ROW_TILE = 128   # pad node dim to a full MXU-friendly row tile


def _round_up(x, m):
    return ((x + m - 1) // m) * m


def _pad2(a, shape):
    return jnp.pad(a, [(0, s - d) for d, s in zip(a.shape, shape)])


def _vmem_limit_bytes():
    """Generation-aware VMEM limit: ~75% of physical (>= 32 MiB)."""
    try:
        cap = pltpu.get_tpu_info().vmem_capacity_bytes
    except Exception:
        cap = 64 * 1024 * 1024
    return max(int(cap * 3 // 4), 32 * 1024 * 1024)


# ---------------------------------------------------------------------------
# Single fused kernel: whole forward pass, grid=(), everything VMEM-resident.
#   layer(t0) = T0@W0' + T1@W1 + L@(T1@W2') + b      (W0'=W0-W2, W2'=2*W2)
# ---------------------------------------------------------------------------
def _fused_cheb_net_kernel(l_ref, x_ref,
                           w10_ref, w11_ref, w12_ref, b1_ref,
                           w20_ref, w21_ref, w22_ref, b2_ref,
                           o_ref, *, n_valid_cols):
    f32 = jnp.float32
    l = l_ref[...]                                  # (Np, Np) bf16, read once

    def cheb_layer(t0, w0p_ref, w1_ref, w2p_ref, b_ref):
        # T1 = L_hat @ T0
        t1 = jnp.dot(l, t0, preferred_element_type=f32).astype(t0.dtype)
        # Reassociated K=2 term: (L@T1)@(2*W2) == L @ (T1 @ (2*W2))
        z = jnp.dot(t1, w2p_ref[...], preferred_element_type=f32).astype(t0.dtype)
        y0 = (jnp.dot(t0, w0p_ref[...], preferred_element_type=f32)
              + jnp.dot(t1, w1_ref[...], preferred_element_type=f32)
              + b_ref[...].astype(f32))
        return y0 + jnp.dot(l, z, preferred_element_type=f32)

    # ---- ChebConv layer 1 + ReLU
    h = jnp.maximum(
        cheb_layer(x_ref[...], w10_ref, w11_ref, w12_ref, b1_ref), 0.0)
    h = h.astype(x_ref.dtype)

    # F.dropout(x, training=self.training): identity under eval semantics.
    # TODO(synk): stochastic training-mode dropout not reproduced.

    # ---- ChebConv layer 2 + masked log_softmax over real output columns
    y = cheb_layer(h, w20_ref, w21_ref, w22_ref, b2_ref)
    cols = lax.broadcasted_iota(jnp.int32, y.shape, 1)
    y = jnp.where(cols < n_valid_cols, y, jnp.float32(-1e30))
    m = jnp.max(y, axis=1, keepdims=True)
    z = y - m
    lse = jnp.log(jnp.sum(jnp.exp(z), axis=1, keepdims=True))
    o_ref[...] = (z - lse).astype(o_ref.dtype)


# ---------------------------------------------------------------------------
# JAX glue: densify the graph into L_hat, pad + cast, run the fused kernel.
# ---------------------------------------------------------------------------
def build_lhat(edge_index, edge_weight, num_nodes):
    """L_hat = 2 L / lambda_max - I with sym norm and lambda_max = 2.0
    => L_hat = -D^{-1/2} A D^{-1/2}, zero diagonal (PyG ChebConv defaults)."""
    row, col = edge_index[0], edge_index[1]
    adj = jnp.zeros((num_nodes, num_nodes), jnp.float32).at[row, col].add(edge_weight)
    deg = adj.sum(axis=1)
    dinv = jnp.where(deg > 0, 1.0 / jnp.sqrt(jnp.maximum(deg, 1e-12)), 0.0)
    return -(dinv[:, None] * adj * dinv[None, :])


def cheb_net_forward(lhat, x, params):
    n, f_in = x.shape
    hid = params["w1"][0].shape[1]
    f_out = params["w2"][0].shape[1]

    f_in_p = _round_up(f_in, LANE)
    hid_p = _round_up(hid, LANE)
    f_out_p = _round_up(f_out, LANE)
    n_p = _round_up(n, ROW_TILE)

    bf16 = jnp.bfloat16
    lhat_p = _pad2(lhat, (n_p, n_p)).astype(bf16)
    x_p = _pad2(x, (n_p, f_in_p)).astype(bf16)

    def fold(ws, fi_p, fo_p):
        w0p = _pad2(ws[0] - ws[2], (fi_p, fo_p)).astype(bf16)   # W0 - W2
        w1 = _pad2(ws[1], (fi_p, fo_p)).astype(bf16)
        w2p = _pad2(2.0 * ws[2], (fi_p, fo_p)).astype(bf16)     # 2*W2
        return w0p, w1, w2p

    w10, w11, w12 = fold(params["w1"], f_in_p, hid_p)
    b1 = _pad2(params["b1"], (1, hid_p)).astype(jnp.float32)
    w20, w21, w22 = fold(params["w2"], hid_p, f_out_p)
    b2 = _pad2(params["b2"], (1, f_out_p)).astype(jnp.float32)

    vmem_limit = _vmem_limit_bytes()
    resident_bytes = int(
        lhat_p.size * 2 + x_p.size * 2
        + (w10.size + w11.size + w12.size + w20.size + w21.size + w22.size) * 2
        + (b1.size + b2.size) * 4
        + n_p * max(hid_p, f_out_p) * 4 * 3    # t1 / z / h / y live intermediates
        + n_p * f_out_p * 4)                   # output
    if resident_bytes > vmem_limit - (8 << 20):
        # TODO(synk): streamed/tiled L_hat fallback for graphs exceeding VMEM.
        raise NotImplementedError(
            f"graph too large for VMEM-resident fused kernel "
            f"({resident_bytes} B > limit {vmem_limit} B)")

    def layer_flops(fi, fo):
        return (2 * n_p * n_p * fi          # L @ T0
                + 2 * n_p * n_p * fo        # L @ Z
                + 3 * 2 * n_p * fi * fo)    # T1@W2', T0@W0', T1@W1
    flops = layer_flops(f_in_p, hid_p) + layer_flops(hid_p, f_out_p)

    vmem_spec = lambda: pl.BlockSpec(memory_space=pltpu.MemorySpace.VMEM)

    out = pl.pallas_call(
        functools.partial(_fused_cheb_net_kernel, n_valid_cols=f_out),
        out_shape=jax.ShapeDtypeStruct((n_p, f_out_p), jnp.float32),
        in_specs=[vmem_spec() for _ in range(10)],
        out_specs=vmem_spec(),
        compiler_params=pltpu.CompilerParams(vmem_limit_bytes=vmem_limit),
        cost_estimate=pl.CostEstimate(
            flops=int(flops),
            transcendentals=int(n_p * f_out_p),
            bytes_accessed=int(resident_bytes)),
    )(lhat_p, x_p, w10, w11, w12, b1, w20, w21, w22, b2)

    return out[:n, :f_out]


# Pure-JAX reference mirroring the kernel's bf16-operand / f32-accum numerics
# (including the reassociated L@(T1@W2') form).
def cheb_net_reference(lhat, x, params):
    bf16 = jnp.bfloat16
    l_b = lhat.astype(bf16)

    def layer(t0_f32, ws, b):
        t0 = t0_f32.astype(bf16)
        w0p = (ws[0] - ws[2]).astype(bf16)
        w1 = ws[1].astype(bf16)
        w2p = (2.0 * ws[2]).astype(bf16)
        t1 = jnp.dot(l_b, t0, preferred_element_type=jnp.float32).astype(bf16)
        z = jnp.dot(t1, w2p, preferred_element_type=jnp.float32).astype(bf16)
        return (jnp.dot(t0, w0p, preferred_element_type=jnp.float32)
                + jnp.dot(t1, w1, preferred_element_type=jnp.float32)
                + b
                + jnp.dot(l_b, z, preferred_element_type=jnp.float32))

    h = jnp.maximum(layer(x, params["w1"], params["b1"]), 0.0)
    y = layer(h, params["w2"], params["b2"])
    return jax.nn.log_softmax(y, axis=1)


if __name__ == "__main__":
    N = 16          # number of graph nodes
    F_IN = 4        # data.num_features (input and final output channels)
    HID = 16        # ChebConv hidden width
    K = 3

    key = jax.random.PRNGKey(0)
    kx, kw1, kb1, kw2, kb2, kew = jax.random.split(key, 6)

    # Node features.
    x = jax.random.normal(kx, (N, F_IN), dtype=jnp.float32)

    # Undirected ring graph with symmetric random positive edge weights.
    src = jnp.arange(N, dtype=jnp.int32)
    dst = (src + 1) % N
    w_half = jax.random.uniform(kew, (N,), minval=0.5, maxval=1.5,
                                dtype=jnp.float32)
    edge_index = jnp.stack([jnp.concatenate([src, dst]),
                            jnp.concatenate([dst, src])])
    edge_weight = jnp.concatenate([w_half, w_half])

    # Deterministic parameter init (glorot-ish scaling), shapes per ChebConv:
    #   conv1: K weights [F_IN, HID] + bias [1, HID]
    #   conv2: K weights [HID, F_IN] + bias [1, F_IN]
    def init_w(k, shape):
        fan_in, fan_out = shape
        scale = jnp.sqrt(2.0 / (fan_in + fan_out)).astype(jnp.float32)
        return scale * jax.random.normal(k, shape, dtype=jnp.float32)

    w1_keys = jax.random.split(kw1, K)
    w2_keys = jax.random.split(kw2, K)
    params = {
        "w1": [init_w(w1_keys[i], (F_IN, HID)) for i in range(K)],
        "b1": 0.01 * jax.random.normal(kb1, (1, HID), dtype=jnp.float32),
        "w2": [init_w(w2_keys[i], (HID, F_IN)) for i in range(K)],
        "b2": 0.01 * jax.random.normal(kb2, (1, F_IN), dtype=jnp.float32),
    }

    lhat = build_lhat(edge_index, edge_weight, N)

    out = cheb_net_forward(lhat, x, params)
    out = jax.block_until_ready(out)

    ref = cheb_net_reference(lhat, x, params)
    assert out.shape == (N, F_IN)
    assert jnp.allclose(out, ref, atol=1e-2, rtol=1e-2), "mismatch vs reference"
    # log_softmax rows must sum (in prob space) to 1.
    assert jnp.allclose(jnp.exp(out).sum(axis=1), 1.0, atol=1e-3)

    print("KERNEL_OK")
</pallas_src>

<mosaic_0001>
module attributes {stable_mosaic.version = 11 : i64} {
  func.func @_fused_cheb_net_kernel(%arg0: memref<128x128xbf16, #tpu.memory_space<vmem>>, %arg1: memref<128x128xbf16, #tpu.memory_space<vmem>>, %arg2: memref<128x128xbf16, #tpu.memory_space<vmem>>, %arg3: memref<128x128xbf16, #tpu.memory_space<vmem>>, %arg4: memref<128x128xbf16, #tpu.memory_space<vmem>>, %arg5: memref<1x128xf32, #tpu.memory_space<vmem>>, %arg6: memref<128x128xbf16, #tpu.memory_space<vmem>>, %arg7: memref<128x128xbf16, #tpu.memory_space<vmem>>, %arg8: memref<128x128xbf16, #tpu.memory_space<vmem>>, %arg9: memref<1x128xf32, #tpu.memory_space<vmem>>, %arg10: memref<128x128xf32, #tpu.memory_space<vmem>>) attributes {dimension_semantics = [], scalar_prefetch = 0 : i64, scratch_operands = 0 : i64, tpu.core_type = #tpu.core_type<tc>} {
    %c0 = arith.constant 0 : index
    %c0_0 = arith.constant 0 : index
    %0 = vector.load %arg0[%c0, %c0_0] : memref<128x128xbf16, #tpu.memory_space<vmem>>, vector<128x128xbf16>
    %c0_1 = arith.constant 0 : index
    %c0_2 = arith.constant 0 : index
    %1 = vector.load %arg1[%c0_1, %c0_2] : memref<128x128xbf16, #tpu.memory_space<vmem>>, vector<128x128xbf16>
    %cst = arith.constant dense<0.000000e+00> : vector<128x128xf32>
    %2 = tpu.matmul %0, %1, %cst {dimension_numbers = #tpu.dot_dimension_numbers<[1], [0], [0], [1], [0, 0, 1, 1], [], []>} : vector<128x128xbf16>, vector<128x128xbf16>, vector<128x128xf32> -> vector<128x128xf32>
    %3 = arith.truncf %2 : vector<128x128xf32> to vector<128x128xbf16>
    %c0_3 = arith.constant 0 : index
    %c0_4 = arith.constant 0 : index
    %4 = vector.load %arg4[%c0_3, %c0_4] : memref<128x128xbf16, #tpu.memory_space<vmem>>, vector<128x128xbf16>
    %cst_5 = arith.constant dense<0.000000e+00> : vector<128x128xf32>
    %5 = tpu.matmul %3, %4, %cst_5 {dimension_numbers = #tpu.dot_dimension_numbers<[1], [0], [0], [1], [0, 0, 1, 1], [], []>} : vector<128x128xbf16>, vector<128x128xbf16>, vector<128x128xf32> -> vector<128x128xf32>
    %6 = arith.truncf %5 : vector<128x128xf32> to vector<128x128xbf16>
    %c0_6 = arith.constant 0 : index
    %c0_7 = arith.constant 0 : index
    %7 = vector.load %arg2[%c0_6, %c0_7] : memref<128x128xbf16, #tpu.memory_space<vmem>>, vector<128x128xbf16>
    %cst_8 = arith.constant dense<0.000000e+00> : vector<128x128xf32>
    %8 = tpu.matmul %1, %7, %cst_8 {dimension_numbers = #tpu.dot_dimension_numbers<[1], [0], [0], [1], [0, 0, 1, 1], [], []>} : vector<128x128xbf16>, vector<128x128xbf16>, vector<128x128xf32> -> vector<128x128xf32>
    %c0_9 = arith.constant 0 : index
    %c0_10 = arith.constant 0 : index
    %9 = vector.load %arg3[%c0_9, %c0_10] : memref<128x128xbf16, #tpu.memory_space<vmem>>, vector<128x128xbf16>
    %cst_11 = arith.constant dense<0.000000e+00> : vector<128x128xf32>
    %10 = tpu.matmul %3, %9, %cst_11 {dimension_numbers = #tpu.dot_dimension_numbers<[1], [0], [0], [1], [0, 0, 1, 1], [], []>} : vector<128x128xbf16>, vector<128x128xbf16>, vector<128x128xf32> -> vector<128x128xf32>
    %11 = arith.addf %8, %10 : vector<128x128xf32>
    %c0_12 = arith.constant 0 : index
    %c0_13 = arith.constant 0 : index
    %12 = vector.load %arg5[%c0_12, %c0_13] : memref<1x128xf32, #tpu.memory_space<vmem>>, vector<1x128xf32>
    %13 = vector.broadcast %12 : vector<1x128xf32> to vector<128x128xf32>
    %14 = arith.addf %11, %13 : vector<128x128xf32>
    %cst_14 = arith.constant dense<0.000000e+00> : vector<128x128xf32>
    %15 = tpu.matmul %0, %6, %cst_14 {dimension_numbers = #tpu.dot_dimension_numbers<[1], [0], [0], [1], [0, 0, 1, 1], [], []>} : vector<128x128xbf16>, vector<128x128xbf16>, vector<128x128xf32> -> vector<128x128xf32>
    %16 = arith.addf %14, %15 : vector<128x128xf32>
    %cst_15 = arith.constant 0.000000e+00 : f32
    %17 = vector.broadcast %cst_15 : f32 to vector<128x128xf32>
    %18 = arith.maximumf %16, %17 : vector<128x128xf32>
    %19 = arith.truncf %18 : vector<128x128xf32> to vector<128x128xbf16>
    %cst_16 = arith.constant dense<0.000000e+00> : vector<128x128xf32>
    %20 = tpu.matmul %0, %19, %cst_16 {dimension_numbers = #tpu.dot_dimension_numbers<[1], [0], [0], [1], [0, 0, 1, 1], [], []>} : vector<128x128xbf16>, vector<128x128xbf16>, vector<128x128xf32> -> vector<128x128xf32>
    %21 = arith.truncf %20 : vector<128x128xf32> to vector<128x128xbf16>
    %c0_17 = arith.constant 0 : index
    %c0_18 = arith.constant 0 : index
    %22 = vector.load %arg8[%c0_17, %c0_18] : memref<128x128xbf16, #tpu.memory_space<vmem>>, vector<128x128xbf16>
    %cst_19 = arith.constant dense<0.000000e+00> : vector<128x128xf32>
    %23 = tpu.matmul %21, %22, %cst_19 {dimension_numbers = #tpu.dot_dimension_numbers<[1], [0], [0], [1], [0, 0, 1, 1], [], []>} : vector<128x128xbf16>, vector<128x128xbf16>, vector<128x128xf32> -> vector<128x128xf32>
    %24 = arith.truncf %23 : vector<128x128xf32> to vector<128x128xbf16>
    %c0_20 = arith.constant 0 : index
    %c0_21 = arith.constant 0 : index
    %25 = vector.load %arg6[%c0_20, %c0_21] : memref<128x128xbf16, #tpu.memory_space<vmem>>, vector<128x128xbf16>
    %cst_22 = arith.constant dense<0.000000e+00> : vector<128x128xf32>
    %26 = tpu.matmul %19, %25, %cst_22 {dimension_numbers = #tpu.dot_dimension_numbers<[1], [0], [0], [1], [0, 0, 1, 1], [], []>} : vector<128x128xbf16>, vector<128x128xbf16>, vector<128x128xf32> -> vector<128x128xf32>
    %c0_23 = arith.constant 0 : index
    %c0_24 = arith.constant 0 : index
    %27 = vector.load %arg7[%c0_23, %c0_24] : memref<128x128xbf16, #tpu.memory_space<vmem>>, vector<128x128xbf16>
    %cst_25 = arith.constant dense<0.000000e+00> : vector<128x128xf32>
    %28 = tpu.matmul %21, %27, %cst_25 {dimension_numbers = #tpu.dot_dimension_numbers<[1], [0], [0], [1], [0, 0, 1, 1], [], []>} : vector<128x128xbf16>, vector<128x128xbf16>, vector<128x128xf32> -> vector<128x128xf32>
    %29 = arith.addf %26, %28 : vector<128x128xf32>
    %c0_26 = arith.constant 0 : index
    %c0_27 = arith.constant 0 : index
    %30 = vector.load %arg9[%c0_26, %c0_27] : memref<1x128xf32, #tpu.memory_space<vmem>>, vector<1x128xf32>
    %31 = vector.broadcast %30 : vector<1x128xf32> to vector<128x128xf32>
    %32 = arith.addf %29, %31 : vector<128x128xf32>
    %cst_28 = arith.constant dense<0.000000e+00> : vector<128x128xf32>
    %33 = tpu.matmul %0, %24, %cst_28 {dimension_numbers = #tpu.dot_dimension_numbers<[1], [0], [0], [1], [0, 0, 1, 1], [], []>} : vector<128x128xbf16>, vector<128x128xbf16>, vector<128x128xf32> -> vector<128x128xf32>
    %34 = arith.addf %32, %33 : vector<128x128xf32>
    %35 = tpu.iota {dimensions = array<i32: 1>} : vector<128x128xi32>
    %c4_i32 = arith.constant 4 : i32
    %36 = vector.broadcast %c4_i32 : i32 to vector<128x128xi32>
    %37 = arith.cmpi slt, %35, %36 : vector<128x128xi32>
    %cst_29 = arith.constant -1.000000e+30 : f32
    %38 = vector.broadcast %cst_29 : f32 to vector<128x128xf32>
    %39 = arith.select %37, %34, %38 : vector<128x128xi1>, vector<128x128xf32>
    %cst_30 = arith.constant dense<0xFF800000> : vector<128xf32>
    %40 = vector.multi_reduction <maximumf>, %39, %cst_30 [1] : vector<128x128xf32> to vector<128xf32>
    %41 = vector.shape_cast %40 : vector<128xf32> to vector<128x1xf32>
    %42 = vector.broadcast %41 : vector<128x1xf32> to vector<128x128xf32>
    %43 = arith.subf %39, %42 : vector<128x128xf32>
    %44 = math.exp %43 : vector<128x128xf32>
    %cst_31 = arith.constant dense<0.000000e+00> : vector<128xf32>
    %45 = vector.multi_reduction <add>, %44, %cst_31 [1] : vector<128x128xf32> to vector<128xf32>
    %46 = vector.shape_cast %45 : vector<128xf32> to vector<128x1xf32>
    %47 = math.log %46 : vector<128x1xf32>
    %48 = vector.broadcast %47 : vector<128x1xf32> to vector<128x128xf32>
    %49 = arith.subf %43, %48 : vector<128x128xf32>
    %c0_32 = arith.constant 0 : index
    %c0_33 = arith.constant 0 : index
    %50 = vector.load %arg10[%c0_32, %c0_33] : memref<128x128xf32, #tpu.memory_space<vmem>>, vector<128x128xf32>
    tpu.vector_store %arg10[%c0_32, %c0_33], %49 {strides = array<i32>} : memref<128x128xf32, #tpu.memory_space<vmem>>, vector<128x128xf32>,
    return
  }
}

</mosaic_0001>

<bundles_post_ra>
// kernel: tpu_custom_call.1
= control target key start
LH: loop header
LB: loop body
LE: loop exit
PB: predicated region body
PF: predicated region fallthrough
CT: control target
= control target key end

     0   :  { %15 = vsyncpa [#allocation3], 0  ;;  %s3456_s0 = inlined_call_operand.hbm [shape: bf16[128,128], index: 0, kind: input, shape index: {}]   ;;  %s3457_s1 = inlined_call_operand.hbm [shape: bf16[128,128], index: 1, kind: input, shape index: {}]   ;;  %s3458_s2 = inlined_call_operand.hbm [shape: bf16[128,128], index: 2, kind: input, shape index: {}]   ;;  %s3459_s3 = inlined_call_operand.hbm [shape: bf16[128,128], index: 3, kind: input, shape index: {}]   ;;  %s3460_s4 = inlined_call_operand.hbm [shape: bf16[128,128], index: 4, kind: input, shape index: {}]   ;;  %s3461_s5 = inlined_call_operand.vmem [shape: f32[1,128], index: 5, kind: input, shape index: {}]   ;;  %s3462_s6 = inlined_call_operand.hbm [shape: bf16[128,128], index: 6, kind: input, shape index: {}]   ;;  %s3463_s7 = inlined_call_operand.hbm [shape: bf16[128,128], index: 7, kind: input, shape index: {}]   ;;  %s3464_s8 = inlined_call_operand.hbm [shape: bf16[128,128], index: 8, kind: input, shape index: {}]   ;;  %s3465_s9 = inlined_call_operand.vmem [shape: f32[1,128], index: 9, kind: input, shape index: {}]   ;;  %s3466_s10 = inlined_call_operand.hbm [shape: f32[128,128], index: 10, kind: output, shape index: {}]  }
   0x1   :  { %16 = vsyncpa [#allocation6], 0 }
   0x2   :  { %17 = vsyncpa [#allocation9], 0 }
   0x3   :  { %18 = vsyncpa [#allocation12], 0 }
   0x4   :  { %19 = vsyncpa [#allocation15], 0 }
   0x5   :  { %20 = vsyncpa [#allocation4], 0  ;;  %s2971_s13 = smov [#allocation5]   ;;  %s2972_s15 = smov [#allocation8]  }
   0x6   :  { %s38_s14 = sshll.u32 %s2971_s13, 4  ;;  %s62_s16 = sshll.u32 %s2972_s15, 4  ;;  %s39_s14 = int_to_ptr.vmem [resolvable:$true] %s38_s14  ;;  %s3039_s16 = int_to_ptr.vmem [resolvable:$true] %s62_s16 }
   0x7   :  { %s2761_s19 = scalar_lea.hbm %s3457_s1, 1024 }
   0x8   :  { %p2762_p0 = scmp.ne.s32.totalorder %s3457_s1, %s2761_s19  ;;  %p2765_p1 = scmp.lt.u32.totalorder %s2761_s19, %s3457_s1 }
   0xa   :  { %p2767_p2 = pnand %p2765_p1, %p2762_p0 }
   0xc   :  { %2770 = shalt.err (!%p2767_p2)
}
   0xd   :  { %s2771_s24 = scalar_lea.vmem %s39_s14, 1024  ;;  %p2776_p4 = scmp.lt.s32.totalorder %s39_s14, %s39_s14 }
   0xe   :  { %p2772_p3 = scmp.ne.s32.totalorder %s39_s14, %s2771_s24  ;;  %p2777_p5 = scmp.lt.s32.totalorder %s2771_s24, %s2771_s24 }
  0x10   :  { %p2778_p6 = por %p2777_p5, %p2776_p4 }
  0x12   :  { %p2779_p7 = pnand %p2778_p6, %p2772_p3 }
  0x14   :  { %2782 = shalt.err (!%p2779_p7)
}
  0x15   :  { %s2973_s25 = smov 64   ;;  %s2974_s26 = smov 4  }
  0x16   :  { %44 = dma.hbm_to_vmem [thread:$0]  %s3457_s1, 1024, %s39_s14, [#allocation6], %s2973_s25, %s2973_s25, %s2974_s26  }
  0x17   :  { %s2783_s11 = scalar_lea.hbm %s3459_s3, 1024 }
  0x18   :  { %p2784_p8 = scmp.ne.s32.totalorder %s3459_s3, %s2783_s11  ;;  %p2787_p9 = scmp.lt.u32.totalorder %s2783_s11, %s3459_s3 }
  0x1a   :  { %p2789_p10 = pnand %p2787_p9, %p2784_p8 }
  0x1c   :  { %2792 = shalt.err (!%p2789_p10)
}
  0x1d   :  { %s2793_s18 = scalar_lea.vmem %s3039_s16, 1024  ;;  %p2798_p12 = scmp.lt.s32.totalorder %s3039_s16, %s3039_s16 }
  0x1e   :  { %p2794_p11 = scmp.ne.s32.totalorder %s3039_s16, %s2793_s18  ;;  %p2799_p13 = scmp.lt.s32.totalorder %s2793_s18, %s2793_s18 }
  0x20   :  { %p2800_p0 = por %p2799_p13, %p2798_p12 }
  0x22   :  { %p2801_p1 = pnand %p2800_p0, %p2794_p11 }
  0x24   :  { %2804 = shalt.err (!%p2801_p1)
}
  0x25   :  { %68 = dma.hbm_to_vmem [thread:$0]  %s3459_s3, 1024, %s3039_s16, [#allocation9], %s2973_s25, %s2973_s25, %s2974_s26  }
  0x26   :  { %s2975_s19 = smov [#allocation11]   ;;  %s2976_s21 = smov [#allocation2]  }
  0x27   :  { %s88_s20 = sshll.u32 %s2975_s19, 4  ;;  %s26_s22 = sshll.u32 %s2976_s21, 4  ;;  %s89_s20 = int_to_ptr.vmem [resolvable:$true] %s88_s20  ;;  %s3076_s22 = int_to_ptr.vmem [resolvable:$true] %s26_s22 }
  0x28   :  { %s2805_s27 = scalar_lea.hbm %s3462_s6, 1024 }
  0x29   :  { %p2806_p2 = scmp.ne.s32.totalorder %s3462_s6, %s2805_s27  ;;  %p2809_p3 = scmp.lt.u32.totalorder %s2805_s27, %s3462_s6 }
  0x2b   :  { %p2811_p4 = pnand %p2809_p3, %p2806_p2 }
  0x2d   :  { %2814 = shalt.err (!%p2811_p4)
}
  0x2e   :  { %s2815_s3 = scalar_lea.vmem %s89_s20, 1024  ;;  %p2820_p6 = scmp.lt.s32.totalorder %s89_s20, %s89_s20 }
  0x2f   :  { %p2816_p5 = scmp.ne.s32.totalorder %s89_s20, %s2815_s3  ;;  %p2821_p7 = scmp.lt.s32.totalorder %s2815_s3, %s2815_s3 }
  0x31   :  { %p2822_p8 = por %p2821_p7, %p2820_p6 }
  0x33   :  { %p2823_p9 = pnand %p2822_p8, %p2816_p5 }
  0x35   :  { %2826 = shalt.err (!%p2823_p9)
}
  0x36   :  { %94 = dma.hbm_to_vmem [thread:$0]  %s3462_s6, 1024, %s89_s20, [#allocation12], %s2973_s25, %s2973_s25, %s2974_s26  }
  0x37   :  { %s2827_s17 = scalar_lea.hbm %s3456_s0, 1024 }
  0x38   :  { %p2828_p10 = scmp.ne.s32.totalorder %s3456_s0, %s2827_s17  ;;  %p2831_p11 = scmp.lt.u32.totalorder %s2827_s17, %s3456_s0 }
  0x3a   :  { %p2833_p12 = pnand %p2831_p11, %p2828_p10 }
  0x3c   :  { %2836 = shalt.err (!%p2833_p12)
}
  0x3d   :  { %s2837_s21 = scalar_lea.vmem %s3076_s22, 1024  ;;  %p2842_p0 = scmp.lt.s32.totalorder %s3076_s22, %s3076_s22 }
  0x3e   :  { %p2838_p13 = scmp.ne.s32.totalorder %s3076_s22, %s2837_s21  ;;  %p2843_p1 = scmp.lt.s32.totalorder %s2837_s21, %s2837_s21 }
  0x40   :  { %p2844_p2 = por %p2843_p1, %p2842_p0 }
  0x42   :  { %p2845_p3 = pnand %p2844_p2, %p2838_p13 }
  0x44   :  { %2848 = shalt.err (!%p2845_p3)
}
  0x45   :  { %32 = dma.hbm_to_vmem [thread:$0]  %s3456_s0, 1024, %s3076_s22, [#allocation3], %s2973_s25, %s2973_s25, %s2974_s26  }
  0x46   :  { %s2977_s23 = smov [#allocation7]   ;;  %s2978_s27 = smov [#allocation10]  }
  0x47   :  { %s50_s24 = sshll.u32 %s2977_s23, 4  ;;  %s74_s28 = sshll.u32 %s2978_s27, 4  ;;  %s51_s24 = int_to_ptr.vmem [resolvable:$true] %s50_s24  ;;  %s3113_s28 = int_to_ptr.vmem [resolvable:$true] %s74_s28 }
  0x48   :  { %s2849_s11 = scalar_lea.hbm %s3458_s2, 1024 }
  0x49   :  { %p2850_p4 = scmp.ne.s32.totalorder %s3458_s2, %s2849_s11  ;;  %p2853_p5 = scmp.lt.u32.totalorder %s2849_s11, %s3458_s2 }
  0x4b   :  { %p2855_p6 = pnand %p2853_p5, %p2850_p4 }
  0x4d   :  { %2858 = shalt.err (!%p2855_p6)
}
  0x4e   :  { %s2859_s0 = scalar_lea.vmem %s51_s24, 1024  ;;  %p2864_p8 = scmp.lt.s32.totalorder %s51_s24, %s51_s24 }
  0x4f   :  { %p2860_p7 = scmp.ne.s32.totalorder %s51_s24, %s2859_s0  ;;  %p2865_p9 = scmp.lt.s32.totalorder %s2859_s0, %s2859_s0 }
  0x51   :  { %p2866_p10 = por %p2865_p9, %p2864_p8 }
  0x53   :  { %p2867_p11 = pnand %p2866_p10, %p2860_p7 }
  0x55   :  { %2870 = shalt.err (!%p2867_p11)
}
  0x56   :  { %56 = dma.hbm_to_vmem [thread:$0]  %s3458_s2, 1024, %s51_s24, [#allocation6], %s2973_s25, %s2973_s25, %s2974_s26  }
  0x57   :  { %s2871_s1 = scalar_lea.hbm %s3460_s4, 1024 }
  0x58   :  { %p2872_p12 = scmp.ne.s32.totalorder %s3460_s4, %s2871_s1  ;;  %p2875_p13 = scmp.lt.u32.totalorder %s2871_s1, %s3460_s4 }
  0x5a   :  { %p2877_p0 = pnand %p2875_p13, %p2872_p12 }
  0x5c   :  { %2880 = shalt.err (!%p2877_p0)
}
  0x5d   :  { %s2881_s20 = scalar_lea.vmem %s3113_s28, 1024  ;;  %p2886_p2 = scmp.lt.s32.totalorder %s3113_s28, %s3113_s28 }
  0x5e   :  { %p2882_p1 = scmp.ne.s32.totalorder %s3113_s28, %s2881_s20  ;;  %p2887_p3 = scmp.lt.s32.totalorder %s2881_s20, %s2881_s20 }
  0x60   :  { %p2888_p4 = por %p2887_p3, %p2886_p2 }
  0x62   :  { %p2889_p5 = pnand %p2888_p4, %p2882_p1 }
  0x64   :  { %2892 = shalt.err (!%p2889_p5)
}
  0x65   :  { %80 = dma.hbm_to_vmem [thread:$0]  %s3460_s4, 1024, %s3113_s28, [#allocation9], %s2973_s25, %s2973_s25, %s2974_s26  }
  0x66   :  { %s2979_s24 = smov [#allocation13]   ;;  %s2980_s29 = smov [#allocation14]  }
  0x67   :  { %s100_s27 = sshll.u32 %s2979_s24, 4  ;;  %s112_s30 = sshll.u32 %s2980_s29, 4  ;;  %s101_s27 = int_to_ptr.vmem [resolvable:$true] %s100_s27  ;;  %s3150_s30 = int_to_ptr.vmem [resolvable:$true] %s112_s30 }
  0x68   :  { %s2893_s16 = scalar_lea.hbm %s3463_s7, 1024 }
  0x69   :  { %p2894_p6 = scmp.ne.s32.totalorder %s3463_s7, %s2893_s16  ;;  %p2897_p7 = scmp.lt.u32.totalorder %s2893_s16, %s3463_s7 }
  0x6b   :  { %p2899_p8 = pnand %p2897_p7, %p2894_p6 }
  0x6d   :  { %2902 = shalt.err (!%p2899_p8)
}
  0x6e   :  { %s2903_s4 = scalar_lea.vmem %s101_s27, 1024  ;;  %p2908_p10 = scmp.lt.s32.totalorder %s101_s27, %s101_s27 }
  0x6f   :  { %p2904_p9 = scmp.ne.s32.totalorder %s101_s27, %s2903_s4  ;;  %p2909_p11 = scmp.lt.s32.totalorder %s2903_s4, %s2903_s4 }
  0x71   :  { %p2910_p12 = por %p2909_p11, %p2908_p10 }
  0x73   :  { %p2911_p13 = pnand %p2910_p12, %p2904_p9 }
  0x75   :  { %2914 = shalt.err (!%p2911_p13)
}
  0x76   :  { %106 = dma.hbm_to_vmem [thread:$0]  %s3463_s7, 1024, %s101_s27, [#allocation12], %s2973_s25, %s2973_s25, %s2974_s26  }
  0x77   :  { %s2915_s1 = scalar_lea.hbm %s3464_s8, 1024 }
  0x78   :  { %p2916_p0 = scmp.ne.s32.totalorder %s3464_s8, %s2915_s1  ;;  %p2919_p1 = scmp.lt.u32.totalorder %s2915_s1, %s3464_s8 }
  0x7a   :  { %p2921_p2 = pnand %p2919_p1, %p2916_p0 }
  0x7c   :  { %2924 = shalt.err (!%p2921_p2)
}
  0x7d   :  { %s2925_s20 = scalar_lea.vmem %s3150_s30, 1024  ;;  %p2930_p4 = scmp.lt.s32.totalorder %s3150_s30, %s3150_s30 }
  0x7e   :  { %p2926_p3 = scmp.ne.s32.totalorder %s3150_s30, %s2925_s20  ;;  %p2931_p5 = scmp.lt.s32.totalorder %s2925_s20, %s2925_s20 }
  0x80   :  { %p2932_p6 = por %p2931_p5, %p2930_p4 }
  0x82   :  { %p2933_p7 = pnand %p2932_p6, %p2926_p3 }
  0x84   :  { %2936 = shalt.err (!%p2933_p7)
}
  0x85   :  { %118 = dma.hbm_to_vmem [thread:$0]  %s3464_s8, 1024, %s3150_s30, [#allocation15], %s2973_s25, %s2973_s25, %s2974_s26  }
  0x86   :  { %2959 = dma.done.wait [#allocation3], 1024  }
  0x87   :  { %2960 = vsyncadd [#allocation3], 4294966272 }
  0x88   :  { %2961 = dma.done.wait [#allocation6], 2048  }
  0x89   :  { %2962 = vsyncadd [#allocation6], 4294965248 }
  0x8a   :  { %2963 = dma.done.wait [#allocation9], 2048  }
  0x8b   :  { %2964 = vsyncadd [#allocation9], 4294965248 }
  0x8c   :  { %2965 = dma.done.wait [#allocation12], 2048  }
  0x8d   :  { %2966 = vsyncadd [#allocation12], 4294965248 }
  0x8e   :  { %2967 = dma.done.wait [#allocation15], 1024  }
  0x8f   :  { %2968 = vsyncadd [#allocation15], 4294966272  ;;  %v3187_v0 = vld [vmem:[#allocation5] sm:$0xff]   ;;  %v3189_v1 = vld [vmem:[#allocation5 + $0x8] sm:$0xff]  }
  0x90   :  { %2204 = vmatprep.subr.bf16.mxu0 %v3187_v0  ;;  %v3194_v2 = vld [vmem:[#allocation5 + $0x10] sm:$0xff]   ;;  %v3197_v3 = vld [vmem:[#allocation5 + $0x18] sm:$0xff]   ;;  %v3200_v4 = vld [vmem:[#allocation2] sm:$0xff]  }
  0x91   :  { %2205 = vmatpush3.bf16.msra.mxu0 %v3187_v0  ;;  %2220 = vmatprep.mubr.bf16.mxu0 %v3200_v4  ;;  %v3206_v5 = vld [vmem:[#allocation5 + $0x20] sm:$0xff]   ;;  %v3210_v6 = vld [vmem:[#allocation5 + $0x28] sm:$0xff]   ;;  %v3214_v7 = vld [vmem:[#allocation5 + $0x30] sm:$0xff]  }
  0x92   :  { %2206 = vmatprep.subr.bf16.mxu0 %v3189_v1  ;;  %2380 = vmatprep.mubr.bf16.mxu1 %v3200_v4  ;;  %v3216_v8 = vld [vmem:[#allocation5 + $0x38] sm:$0xff]   ;;  %v2649_v9 = vld [vmem:[#allocation10] sm:$0xff]   ;;  %v3222_v10 = vld [vmem:[#allocation2 + $0x8] sm:$0xff]  }
  0x93   :  { %v3224_v11 = vld [vmem:[#allocation2 + $0x10] sm:$0xff]   ;;  %v2650_v12 = vld [vmem:[#allocation10 + $0x8] sm:$0xff]   ;;  %v3229_v14 = vld [vmem:[#allocation2 + $0x18] sm:$0xff]  }
  0x94   :  { %v2651_v13 = vld [vmem:[#allocation10 + $0x10] sm:$0xff]   ;;  %v3231_v15 = vld [vmem:[#allocation2 + $0x20] sm:$0xff]   ;;  %v2652_v16 = vld [vmem:[#allocation10 + $0x18] sm:$0xff]  }
  0x95   :  { %2207 = vmatpush3.bf16.msra.mxu0 %v3189_v1  ;;  %v2653_v17 = vld [vmem:[#allocation10 + $0x20] sm:$0xff]   ;;  %v3235_v18 = vld [vmem:[#allocation2 + $0x28] sm:$0xff]   ;;  %v3237_v19 = vld [vmem:[#allocation2 + $0x30] sm:$0xff]  }
  0x96   :  { %2208 = vmatprep.subr.bf16.mxu0 %v3194_v2  ;;  %v2654_v20 = vld [vmem:[#allocation10 + $0x28] sm:$0xff]   ;;  %v2655_v21 = vld [vmem:[#allocation10 + $0x30] sm:$0xff]   ;;  %v3241_v22 = vld [vmem:[#allocation2 + $0x38] sm:$0xff]  }
  0x97   :  { %v2656_v23 = vld [vmem:[#allocation10 + $0x38] sm:$0xff]   ;;  %v2657_v24 = vld [vmem:[#allocation8] sm:$0xff]   ;;  %v2658_v31 = vld [vmem:[#allocation8 + $0x8] sm:$0xff]  }
  0x98   :  { %v2659_v34 = vld [vmem:[#allocation8 + $0x10] sm:$0xff]   ;;  %v2660_v39 = vld [vmem:[#allocation8 + $0x18] sm:$0xff]   ;;  %v2661_v42 = vld [vmem:[#allocation8 + $0x20] sm:$0xff]  }
  0x99   :  { %2209 = vmatpush3.bf16.msra.mxu0 %v3194_v2  ;;  %v2662_v47 = vld [vmem:[#allocation8 + $0x28] sm:$0xff]   ;;  %v2663_v50 = vld [vmem:[#allocation8 + $0x30] sm:$0xff]   ;;  %v2664_v55 = vld [vmem:[#allocation8 + $0x38] sm:$0xff]  }
  0x9a   :  { %2210 = vmatprep.subr.bf16.mxu0 %v3197_v3  ;;  %v2665_v56 = vld [vmem:[#allocation7] sm:$0xff]   ;;  %v2666_v57 = vld [vmem:[#allocation7 + $0x8] sm:$0xff]   ;;  %v2667_v58 = vld [vmem:[#allocation7 + $0x10] sm:$0xff]  }
  0x9b   :  { %v2668_v59 = vld [vmem:[#allocation7 + $0x18] sm:$0xff]   ;;  %v2669_v60 = vld [vmem:[#allocation7 + $0x20] sm:$0xff]   ;;  %v2670_v61 = vld [vmem:[#allocation7 + $0x28] sm:$0xff]  }
  0x9c   :  { %v2671_v62 = vld [vmem:[#allocation7 + $0x30] sm:$0xff]   ;;  %v2672_v63 = vld [vmem:[#allocation7 + $0x38] sm:$0xff]  }
  0x9d   :  { %2211 = vmatpush3.bf16.msra.mxu0 %v3197_v3 }
  0x9e   :  { %2212 = vmatprep.subr.bf16.mxu0 %v3206_v5 }
  0xa1   :  { %2213 = vmatpush3.bf16.msra.mxu0 %v3206_v5 }
  0xa2   :  { %2214 = vmatprep.subr.bf16.mxu0 %v3210_v6 }
  0xa5   :  { %2215 = vmatpush3.bf16.msra.mxu0 %v3210_v6 }
  0xa6   :  { %2216 = vmatprep.subr.bf16.mxu0 %v3214_v7 }
  0xa9   :  { %2217 = vmatpush3.bf16.msra.mxu0 %v3214_v7 }
  0xaa   :  { %2218 = vmatprep.subr.bf16.mxu0 %v3216_v8 }
  0xad   :  { %2219 = vmatpush3.bf16.msra.mxu0 %v3216_v8 }
  0xae   :  { %2236 = vmatprep.subr.bf16.mxu0 %v2649_v9 }
  0xb0   :  { %2221 = vmatmul.mubr.bf16.vlgmr.msra.gmra.mrb[0].mxu0 %v3222_v10 }
  0xb1   :  { %2224 = vmatprep.mubr.bf16.mxu0 %v3224_v11  ;;  %2237 = vmatpush3.bf16.msra.mxu0 %v2649_v9 }
  0xb2   :  { %2238 = vmatprep.subr.bf16.mxu0 %v2650_v12 }
  0xb5   :  { %2239 = vmatpush3.bf16.msra.mxu0 %v2650_v12 }
  0xb6   :  { %2240 = vmatprep.subr.bf16.mxu0 %v2651_v13 }
  0xb8   :  { %2225 = vmatmul.mubr.bf16.gmra.mrb[4].mxu0 %v3229_v14 }
  0xb9   :  { %2228 = vmatprep.mubr.bf16.mxu0 %v3231_v15  ;;  %2241 = vmatpush3.bf16.msra.mxu0 %v2651_v13 }
  0xba   :  { %2242 = vmatprep.subr.bf16.mxu0 %v2652_v16 }
  0xbd   :  { %2243 = vmatpush3.bf16.msra.mxu0 %v2652_v16 }
  0xbe   :  { %2244 = vmatprep.subr.bf16.mxu0 %v2653_v17 }
  0xc0   :  { %2229 = vmatmul.mubr.bf16.gmra.mrb[8].mxu0 %v3235_v18 }
  0xc1   :  { %2232 = vmatprep.mubr.bf16.mxu0 %v3237_v19  ;;  %2245 = vmatpush3.bf16.msra.mxu0 %v2653_v17 }
  0xc2   :  { %2246 = vmatprep.subr.bf16.mxu0 %v2654_v20 }
  0xc5   :  { %2247 = vmatpush3.bf16.msra.mxu0 %v2654_v20 }
  0xc6   :  { %2248 = vmatprep.subr.bf16.mxu0 %v2655_v21 }
  0xc8   :  { %2233 = vmatmul.mubr.bf16.gmra.mrb[12].mxu0 %v3241_v22 }
  0xc9   :  { %2249 = vmatpush3.bf16.msra.mxu0 %v2655_v21 }
  0xca   :  { %2250 = vmatprep.subr.bf16.mxu0 %v2656_v23 }
  0xcd   :  { %2251 = vmatpush3.bf16.msra.mxu0 %v2656_v23 }
  0xce   :  { %2268 = vmatprep.subr.bf16.mxu0 %v2657_v24 }
 0x183   :  { %v2222_v25 = vpop.f32.mrb[0].mxu0 }
 0x184   :  { %v308_v26 = vpop.f32.mrb[1].mxu0 }
 0x185   :  { %v2223_v27 = vpop.f32.mrb[2].mxu0 }
 0x186   :  { %v372_v28 = vpack.c.bf16 %v2223_v27, %v2222_v25  ;;  %v311_v29 = vpop.f32.mrb[3].mxu0 }
 0x187   :  { %v371_v30 = vpack.c.bf16 %v311_v29, %v308_v26 }
 0x189   :  { %2252 = vmatprep.mubr.bf16.mxu0 %v371_v30 }
 0x18a   :  { %2253 = vmatmul.mubr.bf16.vlgmr.msra.gmra.mrb[16].mxu0 %v372_v28 }
 0x18b   :  { %v2226_v32 = vpop.f32.mrb[4].mxu0  ;;  %2269 = vmatpush3.bf16.msra.mxu0 %v2657_v24 }
 0x18c   :  { %v324_v33 = vpop.f32.mrb[5].mxu0  ;;  %2270 = vmatprep.subr.bf16.mxu0 %v2658_v31 }
 0x18d   :  { %v2227_v35 = vpop.f32.mrb[6].mxu0 }
 0x18e   :  { %v374_v36 = vpack.c.bf16 %v2227_v35, %v2226_v32  ;;  %v327_v37 = vpop.f32.mrb[7].mxu0  ;;  %v2018_v32 = vld [vmem:[%s3461_s5] ss:$0 sm:$0xff] }
 0x18f   :  { %v373_v38 = vpack.c.bf16 %v327_v37, %v324_v33  ;;  %2271 = vmatpush3.bf16.msra.mxu0 %v2658_v31 }
 0x190   :  { %2272 = vmatprep.subr.bf16.mxu0 %v2659_v34 }
 0x191   :  { %2256 = vmatprep.mubr.bf16.mxu0 %v373_v38 }
 0x192   :  { %2257 = vmatmul.mubr.bf16.gmra.mrb[20].mxu0 %v374_v36 }
 0x193   :  { %v2230_v40 = vpop.f32.mrb[8].mxu0  ;;  %2273 = vmatpush3.bf16.msra.mxu0 %v2659_v34 }
 0x194   :  { %v340_v41 = vpop.f32.mrb[9].mxu0  ;;  %2274 = vmatprep.subr.bf16.mxu0 %v2660_v39 }
 0x195   :  { %v2231_v43 = vpop.f32.mrb[10].mxu0 }
 0x196   :  { %v376_v44 = vpack.c.bf16 %v2231_v43, %v2230_v40  ;;  %v343_v45 = vpop.f32.mrb[11].mxu0 }
 0x197   :  { %v375_v46 = vpack.c.bf16 %v343_v45, %v340_v41  ;;  %2275 = vmatpush3.bf16.msra.mxu0 %v2660_v39 }
 0x198   :  { %2276 = vmatprep.subr.bf16.mxu0 %v2661_v42 }
 0x199   :  { %2260 = vmatprep.mubr.bf16.mxu0 %v375_v46 }
 0x19a   :  { %2261 = vmatmul.mubr.bf16.gmra.mrb[24].mxu0 %v376_v44 }
 0x19b   :  { %v2234_v48 = vpop.f32.mrb[12].mxu0  ;;  %2277 = vmatpush3.bf16.msra.mxu0 %v2661_v42 }
 0x19c   :  { %v356_v49 = vpop.f32.mrb[13].mxu0  ;;  %2278 = vmatprep.subr.bf16.mxu0 %v2662_v47 }
 0x19d   :  { %v2235_v51 = vpop.f32.mrb[14].mxu0 }
 0x19e   :  { %v378_v52 = vpack.c.bf16 %v2235_v51, %v2234_v48  ;;  %v359_v53 = vpop.f32.mrb[15].mxu0 }
 0x19f   :  { %v377_v54 = vpack.c.bf16 %v359_v53, %v356_v49  ;;  %2279 = vmatpush3.bf16.msra.mxu0 %v2662_v47 }
 0x1a0   :  { %2280 = vmatprep.subr.bf16.mxu0 %v2663_v50 }
 0x1a1   :  { %2264 = vmatprep.mubr.bf16.mxu0 %v377_v54 }
 0x1a2   :  { %2265 = vmatmul.mubr.bf16.gmra.mrb[28].mxu0 %v378_v52 }
 0x1a3   :  { %2281 = vmatpush3.bf16.msra.mxu0 %v2663_v50  ;;  %2284 = vmatprep.mubr.bf16.mxu0 %v371_v30 }
 0x1a4   :  { %2282 = vmatprep.subr.bf16.mxu0 %v2664_v55 }
 0x1a7   :  { %2283 = vmatpush3.bf16.msra.mxu0 %v2664_v55 }
 0x1a8   :  { %2300 = vmatprep.subr.bf16.mxu0 %v2665_v56 }
 0x1aa   :  { %2285 = vmatmul.mubr.bf16.vlgmr.msra.gmra.mrb[32].mxu0 %v372_v28 }
 0x1ab   :  { %2288 = vmatprep.mubr.bf16.mxu0 %v373_v38  ;;  %2301 = vmatpush3.bf16.msra.mxu0 %v2665_v56 }
 0x1ac   :  { %2302 = vmatprep.subr.bf16.mxu0 %v2666_v57 }
 0x1af   :  { %2303 = vmatpush3.bf16.msra.mxu0 %v2666_v57 }
 0x1b0   :  { %2304 = vmatprep.subr.bf16.mxu0 %v2667_v58 }
 0x1b2   :  { %2289 = vmatmul.mubr.bf16.gmra.mrb[36].mxu0 %v374_v36 }
 0x1b3   :  { %2292 = vmatprep.mubr.bf16.mxu0 %v375_v46  ;;  %2305 = vmatpush3.bf16.msra.mxu0 %v2667_v58 }
 0x1b4   :  { %2306 = vmatprep.subr.bf16.mxu0 %v2668_v59 }
 0x1b7   :  { %2307 = vmatpush3.bf16.msra.mxu0 %v2668_v59 }
 0x1b8   :  { %2308 = vmatprep.subr.bf16.mxu0 %v2669_v60 }
 0x1ba   :  { %2293 = vmatmul.mubr.bf16.gmra.mrb[40].mxu0 %v376_v44 }
 0x1bb   :  { %2296 = vmatprep.mubr.bf16.mxu0 %v377_v54  ;;  %2309 = vmatpush3.bf16.msra.mxu0 %v2669_v60 }
 0x1bc   :  { %2310 = vmatprep.subr.bf16.mxu0 %v2670_v61 }
 0x1bf   :  { %2311 = vmatpush3.bf16.msra.mxu0 %v2670_v61 }
 0x1c0   :  { %2312 = vmatprep.subr.bf16.mxu0 %v2671_v62 }
 0x1c2   :  { %2297 = vmatmul.mubr.bf16.gmra.mrb[44].mxu0 %v378_v52 }
 0x1c3   :  { %2313 = vmatpush3.bf16.msra.mxu0 %v2671_v62  ;;  %2316 = vmatprep.mubr.bf16.mxu0 %v3187_v0 }
 0x1c4   :  { %2314 = vmatprep.subr.bf16.mxu0 %v2672_v63 }
 0x1c7   :  { %2315 = vmatpush3.bf16.msra.mxu0 %v2672_v63 }
 0x1ca   :  { %2317 = vmatmul.mubr.bf16.vlgmr.msra.gmra.mrb[32].mxu0 %v3189_v1 }
 0x1cb   :  { %2320 = vmatprep.mubr.bf16.mxu0 %v3194_v2 }
 0x1d2   :  { %2321 = vmatmul.mubr.bf16.gmra.mrb[36].mxu0 %v3197_v3 }
 0x1d3   :  { %2324 = vmatprep.mubr.bf16.mxu0 %v3206_v5 }
 0x1da   :  { %2325 = vmatmul.mubr.bf16.gmra.mrb[40].mxu0 %v3210_v6 }
 0x1db   :  { %2328 = vmatprep.mubr.bf16.mxu0 %v3214_v7 }
 0x1e2   :  { %2329 = vmatmul.mubr.bf16.gmra.mrb[44].mxu0 %v3216_v8 }
 0x1e3   :  { %2348 = vmatprep.mubr.bf16.mxu0 %v3200_v4 }
 0x25d   :  { %v2254_v0 = vpop.f32.mrb[16].mxu0 }
 0x25e   :  { %v477_v9 = vpop.f32.mrb[17].mxu0 }
 0x25f   :  { %v2255_v12 = vpop.f32.mrb[18].mxu0 }
 0x260   :  { %v541_v13 = vpack.c.bf16 %v2255_v12, %v2254_v0  ;;  %v480_v16 = vpop.f32.mrb[19].mxu0 }
 0x261   :  { %v540_v1 = vpack.c.bf16 %v480_v16, %v477_v9 }
 0x263   :  { %2332 = vmatprep.subr.bf16.mxu0 %v540_v1 }
 0x264   :  { %2333 = vmatpush3.bf16.msra.mxu0 %v540_v1 }
 0x265   :  { %v2258_v2 = vpop.f32.mrb[20].mxu0  ;;  %2334 = vmatprep.subr.bf16.mxu0 %v541_v13 }
 0x266   :  { %v493_v3 = vpop.f32.mrb[21].mxu0 }
 0x267   :  { %v2259_v5 = vpop.f32.mrb[22].mxu0 }
 0x268   :  { %v543_v17 = vpack.c.bf16 %v2259_v5, %v2258_v2  ;;  %v496_v6 = vpop.f32.mrb[23].mxu0  ;;  %2335 = vmatpush3.bf16.msra.mxu0 %v541_v13 }
 0x269   :  { %v542_v7 = vpack.c.bf16 %v496_v6, %v493_v3 }
 0x26b   :  { %2336 = vmatprep.subr.bf16.mxu0 %v542_v7 }
 0x26c   :  { %2337 = vmatpush3.bf16.msra.mxu0 %v542_v7 }
 0x26d   :  { %v2262_v8 = vpop.f32.mrb[24].mxu0  ;;  %2338 = vmatprep.subr.bf16.mxu0 %v543_v17 }
 0x26e   :  { %v509_v20 = vpop.f32.mrb[25].mxu0 }
 0x26f   :  { %v2263_v21 = vpop.f32.mrb[26].mxu0 }
 0x270   :  { %v545_v23 = vpack.c.bf16 %v2263_v21, %v2262_v8  ;;  %v512_v24 = vpop.f32.mrb[27].mxu0  ;;  %2339 = vmatpush3.bf16.msra.mxu0 %v543_v17 }
 0x271   :  { %v544_v25 = vpack.c.bf16 %v512_v24, %v509_v20 }
 0x273   :  { %2340 = vmatprep.subr.bf16.mxu0 %v544_v25 }
 0x274   :  { %2341 = vmatpush3.bf16.msra.mxu0 %v544_v25 }
 0x275   :  { %v2266_v26 = vpop.f32.mrb[28].mxu0  ;;  %2342 = vmatprep.subr.bf16.mxu0 %v545_v23 }
 0x276   :  { %v525_v27 = vpop.f32.mrb[29].mxu0 }
 0x277   :  { %v2267_v28 = vpop.f32.mrb[30].mxu0 }
 0x278   :  { %v547_v29 = vpack.c.bf16 %v2267_v28, %v2266_v26  ;;  %v528_v30 = vpop.f32.mrb[31].mxu0  ;;  %2343 = vmatpush3.bf16.msra.mxu0 %v545_v23 }
 0x279   :  { %v546_v31 = vpack.c.bf16 %v528_v30, %v525_v27 }
 0x27b   :  { %2344 = vmatprep.subr.bf16.mxu0 %v546_v31 }
 0x27c   :  { %2345 = vmatpush3.bf16.msra.mxu0 %v546_v31 }
 0x27d   :  { %2346 = vmatprep.subr.bf16.mxu0 %v547_v29 }
 0x280   :  { %2347 = vmatpush3.bf16.msra.mxu0 %v547_v29 }
 0x283   :  { %2349 = vmatmul.mubr.bf16.vlgmr.msra.gmra.mrb[32].mxu0 %v3222_v10 }
 0x284   :  { %2352 = vmatprep.mubr.bf16.mxu0 %v3224_v11 }
 0x28b   :  { %2353 = vmatmul.mubr.bf16.gmra.mrb[36].mxu0 %v3229_v14 }
 0x28c   :  { %2356 = vmatprep.mubr.bf16.mxu0 %v3231_v15 }
 0x293   :  { %2357 = vmatmul.mubr.bf16.gmra.mrb[40].mxu0 %v3235_v18 }
 0x294   :  { %2360 = vmatprep.mubr.bf16.mxu0 %v3237_v19 }
 0x29b   :  { %2361 = vmatmul.mubr.bf16.gmra.mrb[44].mxu0 %v3241_v22 }
 0x356   :  { %v2350_v33 = vpop.f32.mrb[32].mxu0 }
 0x357   :  { %v2524_v34 = vadd.f32 %v2350_v33, %v2018_v32  ;;  %v927_v35 = vpop.f32.mrb[33].mxu0 }
 0x358   :  { %v2525_v36 = vadd.f32 %v2018_v32, %v927_v35  ;;  %v2351_v37 = vpop.f32.mrb[34].mxu0  ;;  %v2675_v35 = vld [vmem:[#allocation14 + $0x10] sm:$0xff]  }
 0x359   :  { %v2526_v38 = vadd.f32 %v2351_v37, %v2018_v32  ;;  %v930_v39 = vpop.f32.mrb[35].mxu0  ;;  %v1008_v41 = vmax.f32 %v2524_v34, 0.0  ;;  %v2673_v34 = vld [vmem:[#allocation14] sm:$0xff]  }
 0x35a   :  { %v2527_v40 = vadd.f32 %v2018_v32, %v930_v39  ;;  %v1006_v43 = vmax.f32 %v2525_v36, 0.0  ;;  %v2676_v36 = vld [vmem:[#allocation14 + $0x18] sm:$0xff]   ;;  %v2677_v37 = vld [vmem:[#allocation14 + $0x20] sm:$0xff]   ;;  %v2679_v39 = vld [vmem:[#allocation14 + $0x30] sm:$0xff]  }
 0x35b   :  { %v1009_v42 = vmax.f32 %v2526_v38, 0.0  ;;  %v2678_v38 = vld [vmem:[#allocation14 + $0x28] sm:$0xff]  }
 0x35c   :  { %v1007_v44 = vmax.f32 %v2527_v40, 0.0  ;;  %v2680_v40 = vld [vmem:[#allocation14 + $0x38] sm:$0xff]  }
 0x35d   :  { %v3263_v45 = vpack.c.bf16 %v1009_v42, %v1008_v41  ;;  %v2681_v41 = vld [vmem:[#allocation13] sm:$0xff]  }
 0x35e   :  { %v3265_v46 = vpack.c.bf16 %v1007_v44, %v1006_v43  ;;  %v2354_v47 = vpop.f32.mrb[36].mxu0 }
 0x35f   :  { %v2528_v48 = vadd.f32 %v2354_v47, %v2018_v32  ;;  %v943_v49 = vpop.f32.mrb[37].mxu0 }
 0x360   :  { %v2529_v50 = vadd.f32 %v2018_v32, %v943_v49  ;;  %v2355_v51 = vpop.f32.mrb[38].mxu0  ;;  %2364 = vmatprep.subr.bf16.mxu1 %v3265_v46 }
 0x361   :  { %v2530_v52 = vadd.f32 %v2355_v51, %v2018_v32  ;;  %v946_v53 = vpop.f32.mrb[39].mxu0  ;;  %2365 = vmatpush3.bf16.msra.mxu1 %v3265_v46  ;;  %v1012_v55 = vmax.f32 %v2528_v48, 0.0 }
 0x362   :  { %v2531_v54 = vadd.f32 %v2018_v32, %v946_v53  ;;  %2366 = vmatprep.subr.bf16.mxu1 %v3263_v45  ;;  %v1010_v57 = vmax.f32 %v2529_v50, 0.0  ;;  %v2682_v50 = vld [vmem:[#allocation13 + $0x8] sm:$0xff]   ;;  %v2683_v53 = vld [vmem:[#allocation13 + $0x10] sm:$0xff]  }
 0x363   :  { %v1013_v56 = vmax.f32 %v2530_v52, 0.0 }
 0x364   :  { %v1011_v58 = vmax.f32 %v2531_v54, 0.0 }
 0x365   :  { %v3270_v59 = vpack.c.bf16 %v1013_v56, %v1012_v55  ;;  %2367 = vmatpush3.bf16.msra.mxu1 %v3263_v45 }
 0x366   :  { %v3273_v60 = vpack.c.bf16 %v1011_v58, %v1010_v57  ;;  %v2358_v61 = vpop.f32.mrb[40].mxu0  ;;  %v2684_v58 = vld [vmem:[#allocation13 + $0x18] sm:$0xff]  }
 0x367   :  { %v2532_v62 = vadd.f32 %v2358_v61, %v2018_v32  ;;  %v959_v63 = vpop.f32.mrb[41].mxu0 }
 0x368   :  { %v2533_v0 = vadd.f32 %v2018_v32, %v959_v63  ;;  %v2359_v9 = vpop.f32.mrb[42].mxu0  ;;  %2368 = vmatprep.subr.bf16.mxu1 %v3273_v60  ;;  %v2685_v63 = vld [vmem:[#allocation13 + $0x20] sm:$0xff]  }
 0x369   :  { %v2534_v12 = vadd.f32 %v2359_v9, %v2018_v32  ;;  %v962_v13 = vpop.f32.mrb[43].mxu0  ;;  %2369 = vmatpush3.bf16.msra.mxu1 %v3273_v60  ;;  %v1016_v1 = vmax.f32 %v2532_v62, 0.0 }
 0x36a   :  { %v2535_v16 = vadd.f32 %v2018_v32, %v962_v13  ;;  %2370 = vmatprep.subr.bf16.mxu1 %v3270_v59  ;;  %v1014_v3 = vmax.f32 %v2533_v0, 0.0 }
 0x36b   :  { %v1017_v2 = vmax.f32 %v2534_v12, 0.0 }
 0x36c   :  { %v1015_v5 = vmax.f32 %v2535_v16, 0.0  ;;  %v2686_v16 = vld [vmem:[#allocation13 + $0x28] sm:$0xff]  }
 0x36d   :  { %v3278_v17 = vpack.c.bf16 %v1017_v2, %v1016_v1  ;;  %2371 = vmatpush3.bf16.msra.mxu1 %v3270_v59 }
 0x36e   :  { %v3281_v6 = vpack.c.bf16 %v1015_v5, %v1014_v3  ;;  %v2362_v7 = vpop.f32.mrb[44].mxu0  ;;  %v2687_v3 = vld [vmem:[#allocation13 + $0x30] sm:$0xff]  }
 0x36f   :  { %v2536_v8 = vadd.f32 %v2362_v7, %v2018_v32  ;;  %v975_v20 = vpop.f32.mrb[45].mxu0 }
 0x370   :  { %v2537_v21 = vadd.f32 %v2018_v32, %v975_v20  ;;  %v2363_v23 = vpop.f32.mrb[46].mxu0  ;;  %2372 = vmatprep.subr.bf16.mxu1 %v3281_v6 }
 0x371   :  { %v2538_v24 = vadd.f32 %v2363_v23, %v2018_v32  ;;  %v978_v25 = vpop.f32.mrb[47].mxu0  ;;  %2373 = vmatpush3.bf16.msra.mxu1 %v3281_v6  ;;  %v1020_v27 = vmax.f32 %v2536_v8, 0.0  ;;  %v2689_v23 = vld [vmem:[#allocation11] sm:$0xff]  }
 0x372   :  { %v2539_v26 = vadd.f32 %v2018_v32, %v978_v25  ;;  %2374 = vmatprep.subr.bf16.mxu1 %v3278_v17  ;;  %v1018_v29 = vmax.f32 %v2537_v21, 0.0  ;;  %v2674_v32 = vld [vmem:[#allocation14 + $0x8] sm:$0xff]   ;;  %v2688_v21 = vld [vmem:[#allocation13 + $0x38] sm:$0xff]   ;;  %v2691_v25 = vld [vmem:[#allocation11 + $0x10] sm:$0xff]  }
 0x373   :  { %v1021_v28 = vmax.f32 %v2538_v24, 0.0  ;;  %v2690_v24 = vld [vmem:[#allocation11 + $0x8] sm:$0xff]  }
 0x374   :  { %v1019_v30 = vmax.f32 %v2539_v26, 0.0  ;;  %v2692_v26 = vld [vmem:[#allocation11 + $0x18] sm:$0xff]  }
 0x375   :  { %v3286_v31 = vpack.c.bf16 %v1021_v28, %v1020_v27  ;;  %2375 = vmatpush3.bf16.msra.mxu1 %v3278_v17  ;;  %v2693_v27 = vld [vmem:[#allocation11 + $0x20] sm:$0xff]   ;;  %v2694_v28 = vld [vmem:[#allocation11 + $0x28] sm:$0xff]  }
 0x376   :  { %v3289_v33 = vpack.c.bf16 %v1019_v30, %v1018_v29  ;;  %v2695_v29 = vld [vmem:[#allocation11 + $0x30] sm:$0xff]   ;;  %v2696_v30 = vld [vmem:[#allocation11 + $0x38] sm:$0xff]  }
 0x378   :  { %2376 = vmatprep.subr.bf16.mxu1 %v3289_v33 }
 0x379   :  { %2377 = vmatpush3.bf16.msra.mxu1 %v3289_v33 }
 0x37a   :  { %2378 = vmatprep.subr.bf16.mxu1 %v3286_v31 }
 0x37d   :  { %2379 = vmatpush3.bf16.msra.mxu1 %v3286_v31 }
 0x37e   :  { %2396 = vmatprep.subr.bf16.mxu1 %v2673_v34 }
 0x380   :  { %2381 = vmatmul.mubr.bf16.vlgmr.msra.gmra.mrb[0].mxu1 %v3222_v10 }
 0x381   :  { %2384 = vmatprep.mubr.bf16.mxu1 %v3224_v11  ;;  %2397 = vmatpush3.bf16.msra.mxu1 %v2673_v34 }
 0x382   :  { %2398 = vmatprep.subr.bf16.mxu1 %v2674_v32 }
 0x385   :  { %2399 = vmatpush3.bf16.msra.mxu1 %v2674_v32 }
 0x386   :  { %2400 = vmatprep.subr.bf16.mxu1 %v2675_v35 }
 0x388   :  { %2385 = vmatmul.mubr.bf16.gmra.mrb[4].mxu1 %v3229_v14 }
 0x389   :  { %2388 = vmatprep.mubr.bf16.mxu1 %v3231_v15  ;;  %2401 = vmatpush3.bf16.msra.mxu1 %v2675_v35 }
 0x38a   :  { %2402 = vmatprep.subr.bf16.mxu1 %v2676_v36 }
 0x38d   :  { %2403 = vmatpush3.bf16.msra.mxu1 %v2676_v36 }
 0x38e   :  { %2404 = vmatprep.subr.bf16.mxu1 %v2677_v37 }
 0x390   :  { %2389 = vmatmul.mubr.bf16.gmra.mrb[8].mxu1 %v3235_v18 }
 0x391   :  { %2392 = vmatprep.mubr.bf16.mxu1 %v3237_v19  ;;  %2405 = vmatpush3.bf16.msra.mxu1 %v2677_v37 }
 0x392   :  { %2406 = vmatprep.subr.bf16.mxu1 %v2678_v38 }
 0x395   :  { %2407 = vmatpush3.bf16.msra.mxu1 %v2678_v38 }
 0x396   :  { %2408 = vmatprep.subr.bf16.mxu1 %v2679_v39 }
 0x398   :  { %2393 = vmatmul.mubr.bf16.gmra.mrb[12].mxu1 %v3241_v22 }
 0x399   :  { %2409 = vmatpush3.bf16.msra.mxu1 %v2679_v39 }
 0x39a   :  { %2410 = vmatprep.subr.bf16.mxu1 %v2680_v40 }
 0x39d   :  { %2411 = vmatpush3.bf16.msra.mxu1 %v2680_v40 }
 0x39e   :  { %2428 = vmatprep.subr.bf16.mxu1 %v2681_v41 }
 0x453   :  { %v2382_v42 = vpop.f32.mrb[0].mxu1 }
 0x454   :  { %v1064_v43 = vpop.f32.mrb[1].mxu1 }
 0x455   :  { %v2383_v44 = vpop.f32.mrb[2].mxu1 }
 0x456   :  { %v1128_v47 = vpack.c.bf16 %v2383_v44, %v2382_v42  ;;  %v1067_v48 = vpop.f32.mrb[3].mxu1 }
 0x457   :  { %v1127_v49 = vpack.c.bf16 %v1067_v48, %v1064_v43 }
 0x459   :  { %2412 = vmatprep.mubr.bf16.mxu1 %v1127_v49 }
 0x45a   :  { %2413 = vmatmul.mubr.bf16.vlgmr.msra.gmra.mrb[16].mxu1 %v1128_v47 }
 0x45b   :  { %v2386_v51 = vpop.f32.mrb[4].mxu1  ;;  %2429 = vmatpush3.bf16.msra.mxu1 %v2681_v41 }
 0x45c   :  { %v1080_v52 = vpop.f32.mrb[5].mxu1  ;;  %2430 = vmatprep.subr.bf16.mxu1 %v2682_v50 }
 0x45d   :  { %v2387_v54 = vpop.f32.mrb[6].mxu1 }
 0x45e   :  { %v1130_v55 = vpack.c.bf16 %v2387_v54, %v2386_v51  ;;  %v1083_v56 = vpop.f32.mrb[7].mxu1 }
 0x45f   :  { %v1129_v57 = vpack.c.bf16 %v1083_v56, %v1080_v52  ;;  %2431 = vmatpush3.bf16.msra.mxu1 %v2682_v50  ;;  %v1762_v50 = vlaneseq  ;;  %v2043_v52 = vld [vmem:[%s3465_s9] ss:$0 sm:$0xff]  ;;  %s2981_s9 = smov [#allocation16]  }
 0x460   :  { %2432 = vmatprep.subr.bf16.mxu1 %v2683_v53  ;;  %s1962_s23 = sshll.u32 %s2981_s9, 4  ;;  %s1963_s23 = int_to_ptr.vmem [resolvable:$true] %s1962_s23 }
 0x461   :  { %2416 = vmatprep.mubr.bf16.mxu1 %v1129_v57  ;;  %v3318_v51 = vand.u32 127, %v1762_v50  ;;  %s2937_s24 = scalar_lea.vmem %s1963_s23, 2048  ;;  %p2942_p9 = scmp.lt.s32.totalorder %s1963_s23, %s1963_s23 }
 0x462   :  { %2417 = vmatmul.mubr.bf16.gmra.mrb[20].mxu1 %v1130_v55  ;;  %p2938_p8 = scmp.ne.s32.totalorder %s1963_s23, %s2937_s24  ;;  %p2943_p10 = scmp.lt.s32.totalorder %s2937_s24, %s2937_s24 }
 0x463   :  { %v2390_v61 = vpop.f32.mrb[8].mxu1  ;;  %2433 = vmatpush3.bf16.msra.mxu1 %v2683_v53  ;;  %vm1764_vm0 = vcmp.lt.s32.totalorder %v3318_v51, 4 }
 0x464   :  { %v1096_v62 = vpop.f32.mrb[9].mxu1  ;;  %2434 = vmatprep.subr.bf16.mxu1 %v2684_v58  ;;  %p2944_p11 = por %p2943_p10, %p2942_p9 }
 0x465   :  { %v2391_v0 = vpop.f32.mrb[10].mxu1 }
 0x466   :  { %v1132_v9 = vpack.c.bf16 %v2391_v0, %v2390_v61  ;;  %v1099_v12 = vpop.f32.mrb[11].mxu1  ;;  %p2945_p12 = pnand %p2944_p11, %p2938_p8 }
 0x467   :  { %v1131_v13 = vpack.c.bf16 %v1099_v12, %v1096_v62  ;;  %2435 = vmatpush3.bf16.msra.mxu1 %v2684_v58 }
 0x468   :  { %2436 = vmatprep.subr.bf16.mxu1 %v2685_v63 }
 0x469   :  { %2420 = vmatprep.mubr.bf16.mxu1 %v1131_v13 }
 0x46a   :  { %2421 = vmatmul.mubr.bf16.gmra.mrb[24].mxu1 %v1132_v9 }
 0x46b   :  { %v2394_v1 = vpop.f32.mrb[12].mxu1  ;;  %2437 = vmatpush3.bf16.msra.mxu1 %v2685_v63 }
 0x46c   :  { %v1112_v2 = vpop.f32.mrb[13].mxu1  ;;  %2438 = vmatprep.subr.bf16.mxu1 %v2686_v16 }
 0x46d   :  { %v2395_v5 = vpop.f32.mrb[14].mxu1 }
 0x46e   :  { %v1134_v7 = vpack.c.bf16 %v2395_v5, %v2394_v1  ;;  %v1115_v8 = vpop.f32.mrb[15].mxu1 }
 0x46f   :  { %v1133_v20 = vpack.c.bf16 %v1115_v8, %v1112_v2  ;;  %2439 = vmatpush3.bf16.msra.mxu1 %v2686_v16 }
 0x470   :  { %2440 = vmatprep.subr.bf16.mxu1 %v2687_v3 }
 0x471   :  { %2424 = vmatprep.mubr.bf16.mxu1 %v1133_v20 }
 0x472   :  { %2425 = vmatmul.mubr.bf16.gmra.mrb[28].mxu1 %v1134_v7 }
 0x473   :  { %2441 = vmatpush3.bf16.msra.mxu1 %v2687_v3  ;;  %2444 = vmatprep.mubr.bf16.mxu1 %v1127_v49 }
 0x474   :  { %2442 = vmatprep.subr.bf16.mxu1 %v2688_v21 }
 0x477   :  { %2443 = vmatpush3.bf16.msra.mxu1 %v2688_v21 }
 0x478   :  { %2460 = vmatprep.subr.bf16.mxu1 %v2689_v23 }
 0x47a   :  { %2445 = vmatmul.mubr.bf16.vlgmr.msra.gmra.mrb[32].mxu1 %v1128_v47 }
 0x47b   :  { %2448 = vmatprep.mubr.bf16.mxu1 %v1129_v57  ;;  %2461 = vmatpush3.bf16.msra.mxu1 %v2689_v23 }
 0x47c   :  { %2462 = vmatprep.subr.bf16.mxu1 %v2690_v24 }
 0x47f   :  { %2463 = vmatpush3.bf16.msra.mxu1 %v2690_v24 }
 0x480   :  { %2464 = vmatprep.subr.bf16.mxu1 %v2691_v25 }
 0x482   :  { %2449 = vmatmul.mubr.bf16.gmra.mrb[36].mxu1 %v1130_v55 }
 0x483   :  { %2452 = vmatprep.mubr.bf16.mxu1 %v1131_v13  ;;  %2465 = vmatpush3.bf16.msra.mxu1 %v2691_v25 }
 0x484   :  { %2466 = vmatprep.subr.bf16.mxu1 %v2692_v26 }
 0x487   :  { %2467 = vmatpush3.bf16.msra.mxu1 %v2692_v26 }
 0x488   :  { %2468 = vmatprep.subr.bf16.mxu1 %v2693_v27 }
 0x48a   :  { %2453 = vmatmul.mubr.bf16.gmra.mrb[40].mxu1 %v1132_v9 }
 0x48b   :  { %2456 = vmatprep.mubr.bf16.mxu1 %v1133_v20  ;;  %2469 = vmatpush3.bf16.msra.mxu1 %v2693_v27 }
 0x48c   :  { %2470 = vmatprep.subr.bf16.mxu1 %v2694_v28 }
 0x48f   :  { %2471 = vmatpush3.bf16.msra.mxu1 %v2694_v28 }
 0x490   :  { %2472 = vmatprep.subr.bf16.mxu1 %v2695_v29 }
 0x492   :  { %2457 = vmatmul.mubr.bf16.gmra.mrb[44].mxu1 %v1134_v7 }
 0x493   :  { %2473 = vmatpush3.bf16.msra.mxu1 %v2695_v29  ;;  %2476 = vmatprep.mubr.bf16.mxu1 %v3265_v46 }
 0x494   :  { %2474 = vmatprep.subr.bf16.mxu1 %v2696_v30 }
 0x497   :  { %2475 = vmatpush3.bf16.msra.mxu1 %v2696_v30 }
 0x49a   :  { %2477 = vmatmul.mubr.bf16.vlgmr.msra.gmra.mrb[32].mxu1 %v3263_v45 }
 0x49b   :  { %2480 = vmatprep.mubr.bf16.mxu1 %v3273_v60 }
 0x4a2   :  { %2481 = vmatmul.mubr.bf16.gmra.mrb[36].mxu1 %v3270_v59 }
 0x4a3   :  { %2484 = vmatprep.mubr.bf16.mxu1 %v3281_v6 }
 0x4aa   :  { %2485 = vmatmul.mubr.bf16.gmra.mrb[40].mxu1 %v3278_v17 }
 0x4ab   :  { %2488 = vmatprep.mubr.bf16.mxu1 %v3289_v33 }
 0x4b2   :  { %2489 = vmatmul.mubr.bf16.gmra.mrb[44].mxu1 %v3286_v31 }
 0x4b3   :  { %2508 = vmatprep.mubr.bf16.mxu1 %v3200_v4 }
 0x52d   :  { %v2414_v34 = vpop.f32.mrb[16].mxu1 }
 0x52e   :  { %v1233_v46 = vpop.f32.mrb[17].mxu1 }
 0x52f   :  { %v2415_v32 = vpop.f32.mrb[18].mxu1 }
 0x530   :  { %v1297_v35 = vpack.c.bf16 %v2415_v32, %v2414_v34  ;;  %v1236_v36 = vpop.f32.mrb[19].mxu1 }
 0x531   :  { %v1296_v45 = vpack.c.bf16 %v1236_v36, %v1233_v46 }
 0x533   :  { %2492 = vmatprep.subr.bf16.mxu1 %v1296_v45 }
 0x534   :  { %2493 = vmatpush3.bf16.msra.mxu1 %v1296_v45 }
 0x535   :  { %v2418_v60 = vpop.f32.mrb[20].mxu1  ;;  %2494 = vmatprep.subr.bf16.mxu1 %v1297_v35 }
 0x536   :  { %v1249_v59 = vpop.f32.mrb[21].mxu1 }
 0x537   :  { %v2419_v6 = vpop.f32.mrb[22].mxu1 }
 0x538   :  { %v1299_v37 = vpack.c.bf16 %v2419_v6, %v2418_v60  ;;  %v1252_v17 = vpop.f32.mrb[23].mxu1  ;;  %2495 = vmatpush3.bf16.msra.mxu1 %v1297_v35 }
 0x539   :  { %v1298_v33 = vpack.c.bf16 %v1252_v17, %v1249_v59 }
 0x53b   :  { %2496 = vmatprep.subr.bf16.mxu1 %v1298_v33 }
 0x53c   :  { %2497 = vmatpush3.bf16.msra.mxu1 %v1298_v33 }
 0x53d   :  { %v2422_v31 = vpop.f32.mrb[24].mxu1  ;;  %2498 = vmatprep.subr.bf16.mxu1 %v1299_v37 }
 0x53e   :  { %v1265_v4 = vpop.f32.mrb[25].mxu1 }
 0x53f   :  { %v2423_v38 = vpop.f32.mrb[26].mxu1 }
 0x540   :  { %v1301_v39 = vpack.c.bf16 %v2423_v38, %v2422_v31  ;;  %v1268_v40 = vpop.f32.mrb[27].mxu1  ;;  %2499 = vmatpush3.bf16.msra.mxu1 %v1299_v37 }
 0x541   :  { %v1300_v41 = vpack.c.bf16 %v1268_v40, %v1265_v4 }
 0x543   :  { %2500 = vmatprep.subr.bf16.mxu1 %v1300_v41 }
 0x544   :  { %2501 = vmatpush3.bf16.msra.mxu1 %v1300_v41 }
 0x545   :  { %v2426_v42 = vpop.f32.mrb[28].mxu1  ;;  %2502 = vmatprep.subr.bf16.mxu1 %v1301_v39 }
 0x546   :  { %v1281_v43 = vpop.f32.mrb[29].mxu1 }
 0x547   :  { %v2427_v44 = vpop.f32.mrb[30].mxu1 }
 0x548   :  { %v1303_v47 = vpack.c.bf16 %v2427_v44, %v2426_v42  ;;  %v1284_v48 = vpop.f32.mrb[31].mxu1  ;;  %2503 = vmatpush3.bf16.msra.mxu1 %v1301_v39 }
 0x549   :  { %v1302_v49 = vpack.c.bf16 %v1284_v48, %v1281_v43 }
 0x54b   :  { %2504 = vmatprep.subr.bf16.mxu1 %v1302_v49 }
 0x54c   :  { %2505 = vmatpush3.bf16.msra.mxu1 %v1302_v49 }
 0x54d   :  { %2506 = vmatprep.subr.bf16.mxu1 %v1303_v47 }
 0x550   :  { %2507 = vmatpush3.bf16.msra.mxu1 %v1303_v47 }
 0x553   :  { %2509 = vmatmul.mubr.bf16.vlgmr.msra.gmra.mrb[32].mxu1 %v3222_v10 }
 0x554   :  { %2512 = vmatprep.mubr.bf16.mxu1 %v3224_v11 }
 0x55b   :  { %2513 = vmatmul.mubr.bf16.gmra.mrb[36].mxu1 %v3229_v14 }
 0x55c   :  { %2516 = vmatprep.mubr.bf16.mxu1 %v3231_v15 }
 0x563   :  { %2517 = vmatmul.mubr.bf16.gmra.mrb[40].mxu1 %v3235_v18 }
 0x564   :  { %2520 = vmatprep.mubr.bf16.mxu1 %v3237_v19 }
 0x56b   :  { %2521 = vmatmul.mubr.bf16.gmra.mrb[44].mxu1 %v3241_v22 }
 0x626   :  { %v2510_v10 = vpop.f32.mrb[32].mxu1 }
 0x627   :  { %v2540_v11 = vadd.f32 %v2510_v10, %v2043_v52  ;;  %v1683_v14 = vpop.f32.mrb[33].mxu1 }
 0x628   :  { %v2541_v53 = vadd.f32 %v2043_v52, %v1683_v14  ;;  %v2511_v15 = vpop.f32.mrb[34].mxu1 }
 0x629   :  { %v2542_v54 = vadd.f32 %v2511_v15, %v2043_v52  ;;  %v1686_v18 = vpop.f32.mrb[35].mxu1  ;;  %v1767_v19 = vsel %vm1764_vm0, %v2540_v11, -1e+30 }
 0x62a   :  { %v2543_v22 = vadd.f32 %v2043_v52, %v1686_v18  ;;  %1785 = vmax.xlane.f32.xlu1 %v1767_v19  ;;  %v1765_v55 = vsel %vm1764_vm0, %v2541_v53, -1e+30 }
 0x62b   :  { %1781 = vmax.xlane.f32.xlu0 %v1765_v55  ;;  %v1768_v56 = vsel %vm1764_vm0, %v2542_v54, -1e+30 }
 0x62c   :  { %v1766_v58 = vsel %vm1764_vm0, %v2543_v22, -1e+30 }
 0x62e   :  { %1787 = vmax.xlane.f32.xlu1 %v1768_v56  ;;  %v2514_v57 = vpop.f32.mrb[36].mxu1 }
 0x62f   :  { %v2544_v61 = vadd.f32 %v2514_v57, %v2043_v52  ;;  %1783 = vmax.xlane.f32.xlu0 %v1766_v58  ;;  %v1699_v62 = vpop.f32.mrb[37].mxu1 }
 0x630   :  { %v2515_v63 = vpop.f32.mrb[38].mxu1  ;;  %v2545_v13 = vadd.f32 %v2043_v52, %v1699_v62 }
 0x631   :  { %v2546_v0 = vadd.f32 %v2515_v63, %v2043_v52  ;;  %v1702_v9 = vpop.f32.mrb[39].mxu1  ;;  %v1771_v12 = vsel %vm1764_vm0, %v2544_v61, -1e+30 }
 0x632   :  { %v2547_v16 = vadd.f32 %v2043_v52, %v1702_v9  ;;  %v1769_v3 = vsel %vm1764_vm0, %v2545_v13, -1e+30 }
 0x633   :  { %1793 = vmax.xlane.f32.xlu0 %v1771_v12  ;;  %v1772_v1 = vsel %vm1764_vm0, %v2546_v0, -1e+30 }
 0x634   :  { %1795 = vmax.xlane.f32.xlu1 %v1772_v1  ;;  %v1770_v8 = vsel %vm1764_vm0, %v2547_v16, -1e+30 }
 0x636   :  { %v2518_v2 = vpop.f32.mrb[40].mxu1 }
 0x637   :  { %v2548_v5 = vadd.f32 %v2518_v2, %v2043_v52  ;;  %1789 = vmax.xlane.f32.xlu0 %v1769_v3  ;;  %v1715_v7 = vpop.f32.mrb[41].mxu1 }
 0x638   :  { %1791 = vmax.xlane.f32.xlu1 %v1770_v8  ;;  %v2519_v20 = vpop.f32.mrb[42].mxu1  ;;  %v2549_v25 = vadd.f32 %v2043_v52, %v1715_v7 }
 0x639   :  { %v2550_v21 = vadd.f32 %v2519_v20, %v2043_v52  ;;  %v1718_v23 = vpop.f32.mrb[43].mxu1  ;;  %v1775_v24 = vsel %vm1764_vm0, %v2548_v5, -1e+30 }
 0x63a   :  { %v2551_v26 = vadd.f32 %v2043_v52, %v1718_v23  ;;  %v3346_v29 = vsel %vm1764_vm0, %v2549_v25, -1e+30 }
 0x63b   :  { %1801 = vmax.xlane.f32.xlu0 %v1775_v24  ;;  %v1776_v27 = vsel %vm1764_vm0, %v2550_v21, -1e+30 }
 0x63c   :  { %1803 = vmax.xlane.f32.xlu1 %v1776_v27  ;;  %v3351_v34 = vsel %vm1764_vm0, %v2551_v26, -1e+30 }
 0x63e   :  { %v2522_v28 = vpop.f32.mrb[44].mxu1 }
 0x63f   :  { %1797 = vmax.xlane.f32.xlu0 %v3346_v29  ;;  %v1731_v30 = vpop.f32.mrb[45].mxu1  ;;  %v2552_v36 = vadd.f32 %v2522_v28, %v2043_v52 }
 0x640   :  { %v2553_v46 = vadd.f32 %v2043_v52, %v1731_v30  ;;  %1799 = vmax.xlane.f32.xlu1 %v3351_v34  ;;  %v2523_v32 = vpop.f32.mrb[46].mxu1 }
 0x641   :  { %v1734_v35 = vpop.f32.mrb[47].mxu1  ;;  %v2554_v59 = vadd.f32 %v2523_v32, %v2043_v52  ;;  %v3366_v37 = vsel %vm1764_vm0, %v2552_v36, -1e+30 }
 0x642   :  { %v2555_v45 = vadd.f32 %v2043_v52, %v1734_v35  ;;  %v3356_v60 = vsel %vm1764_vm0, %v2553_v46, -1e+30 }
 0x643   :  { %1805 = vmax.xlane.f32.xlu0 %v3356_v60  ;;  %v3371_v17 = vsel %vm1764_vm0, %v2554_v59, -1e+30 }
 0x644   :  { %v3361_v6 = vsel %vm1764_vm0, %v2555_v45, -1e+30 }
 0x645   :  { %1807 = vmax.xlane.f32.xlu1 %v3361_v6 }
 0x647   :  { %1809 = vmax.xlane.f32.xlu0 %v3366_v37 }
 0x649   :  { %1811 = vmax.xlane.f32.xlu1 %v3371_v17 }
 0x6b7   :  { %v1786_v33 = vpop.xlane.xlu1 %1785 }
 0x6b8   :  { %v3374_v31 = vsub.f32 %v1767_v19, %v1786_v33  ;;  %v1782_v4 = vpop.xlane.xlu0 %1781 }
 0x6b9   :  { %v3376_v38 = vsub.f32 %v1765_v55, %v1782_v4 }
 0x6ba   :  { %v1833_v39 = vmul.f32 1.442695, %v3374_v31 }
 0x6bb   :  { %v1829_v40 = vmul.f32 1.442695, %v3376_v38  ;;  %v1788_v41 = vpop.xlane.xlu1 %1787 }
 0x6bc   :  { %2697 = vpow2.f32 %v1833_v39  ;;  %v3380_v42 = vsub.f32 %v1768_v56, %v1788_v41  ;;  %v1784_v43 = vpop.xlane.xlu0 %1783 }
 0x6bd   :  { %v3382_v44 = vsub.f32 %v1766_v58, %v1784_v43  ;;  %2699 = vpow2.f32 %v1829_v40 }
 0x6be   :  { %v1835_v47 = vmul.f32 1.442695, %v3380_v42 }
 0x6bf   :  { %v1831_v48 = vmul.f32 1.442695, %v3382_v44 }
 0x6c0   :  { %2701 = vpow2.f32 %v1835_v47  ;;  %v1794_v49 = vpop.xlane.xlu0 %1793 }
 0x6c1   :  { %v3386_v50 = vsub.f32 %v1771_v12, %v1794_v49  ;;  %v1796_v51 = vpop.xlane.xlu1 %1795  ;;  %2703 = vpow2.f32 %v1831_v48 }
 0x6c2   :  { %v3388_v52 = vsub.f32 %v1772_v1, %v1796_v51 }
 0x6c3   :  { %v1841_v10 = vmul.f32 1.442695, %v3386_v50 }
 0x6c4   :  { %v1843_v11 = vmul.f32 1.442695, %v3388_v52  ;;  %v1790_v14 = vpop.xlane.xlu0 %1789 }
 0x6c5   :  { %2705 = vpow2.f32 %v1841_v10  ;;  %v3392_v53 = vsub.f32 %v1769_v3, %v1790_v14  ;;  %v1792_v15 = vpop.xlane.xlu1 %1791 }
 0x6c6   :  { %v2698_v54 = vpop.eup %2697  ;;  %v3394_v18 = vsub.f32 %v1770_v8, %v1792_v15  ;;  %2707 = vpow2.f32 %v1843_v11 }
 0x6c7   :  { %v1837_v19 = vmul.f32 1.442695, %v3392_v53  ;;  %1865 = vadd.xlane.f32.xlu0 %v2698_v54  ;;  %v2700_v56 = vpop.eup %2699 }
 0x6c8   :  { %v1839_v22 = vmul.f32 1.442695, %v3394_v18  ;;  %v1802_v55 = vpop.xlane.xlu0 %1801 }
 0x6c9   :  { %2709 = vpow2.f32 %v1837_v19  ;;  %v3398_v57 = vsub.f32 %v1775_v24, %v1802_v55  ;;  %v1804_v58 = vpop.xlane.xlu1 %1803 }
 0x6ca   :  { %v2702_v61 = vpop.eup %2701  ;;  %v3400_v62 = vsub.f32 %v1776_v27, %v1804_v58  ;;  %2711 = vpow2.f32 %v1839_v22 }
 0x6cb   :  { %v1849_v63 = vmul.f32 1.442695, %v3398_v57  ;;  %1861 = vadd.xlane.f32.xlu0 %v2700_v56  ;;  %1867 = vadd.xlane.f32.xlu1 %v2702_v61  ;;  %v2704_v16 = vpop.eup %2703 }
 0x6cc   :  { %v1851_v0 = vmul.f32 1.442695, %v3400_v62  ;;  %v1798_v9 = vpop.xlane.xlu0 %1797 }
 0x6cd   :  { %2713 = vpow2.f32 %v1849_v63  ;;  %v3405_v12 = vsub.f32 %v3346_v29, %v1798_v9  ;;  %v1800_v13 = vpop.xlane.xlu1 %1799 }
 0x6ce   :  { %v3408_v1 = vsub.f32 %v3351_v34, %v1800_v13  ;;  %2715 = vpow2.f32 %v1851_v0 }
 0x6cf   :  { %v2706_v2 = vpop.eup %2705  ;;  %v1845_v3 = vmul.f32 1.442695, %v3405_v12  ;;  %1863 = vadd.xlane.f32.xlu1 %v2704_v16 }
 0x6d0   :  { %v1847_v5 = vmul.f32 1.442695, %v3408_v1  ;;  %1873 = vadd.xlane.f32.xlu0 %v2706_v2  ;;  %v1806_v7 = vpop.xlane.xlu0 %1805  ;;  %v2708_v20 = vpop.eup %2707 }
 0x6d1   :  { %2717 = vpow2.f32 %v1845_v3  ;;  %v3413_v8 = vsub.f32 %v3356_v60, %v1806_v7 }
 0x6d2   :  { %v1808_v21 = vpop.xlane.xlu1 %1807  ;;  %2719 = vpow2.f32 %v1847_v5 }
 0x6d3   :  { %v2710_v23 = vpop.eup %2709  ;;  %v1853_v24 = vmul.f32 1.442695, %v3413_v8  ;;  %v3417_v25 = vsub.f32 %v3361_v6, %v1808_v21  ;;  %1875 = vadd.xlane.f32.xlu1 %v2708_v20 }
 0x6d4   :  { %1869 = vadd.xlane.f32.xlu0 %v2710_v23  ;;  %v1810_v26 = vpop.xlane.xlu0 %1809  ;;  %v2712_v29 = vpop.eup %2711 }
 0x6d5   :  { %2721 = vpow2.f32 %v1853_v24  ;;  %v1855_v27 = vmul.f32 1.442695, %v3417_v25  ;;  %v3421_v28 = vsub.f32 %v3366_v37, %v1810_v26 }
 0x6d6   :  { %v1812_v30 = vpop.xlane.xlu1 %1811 }
 0x6d7   :  { %v2714_v34 = vpop.eup %2713  ;;  %2723 = vpow2.f32 %v1855_v27  ;;  %v1857_v46 = vmul.f32 1.442695, %v3421_v28  ;;  %v3425_v32 = vsub.f32 %v3371_v17, %v1812_v30  ;;  %1871 = vadd.xlane.f32.xlu1 %v2712_v29 }
 0x6d8   :  { %1881 = vadd.xlane.f32.xlu0 %v2714_v34  ;;  %v2716_v36 = vpop.eup %2715 }
 0x6d9   :  { %2725 = vpow2.f32 %v1857_v46  ;;  %v1859_v35 = vmul.f32 1.442695, %v3425_v32 }
 0x6db   :  { %v2718_v45 = vpop.eup %2717  ;;  %2727 = vpow2.f32 %v1859_v35  ;;  %1883 = vadd.xlane.f32.xlu1 %v2716_v36 }
 0x6dc   :  { %1877 = vadd.xlane.f32.xlu0 %v2718_v45  ;;  %v2720_v60 = vpop.eup %2719 }
 0x6df   :  { %v2722_v59 = vpop.eup %2721  ;;  %1879 = vadd.xlane.f32.xlu1 %v2720_v60 }
 0x6e0   :  { %1885 = vadd.xlane.f32.xlu0 %v2722_v59 }
 0x6e1   :  { %v2724_v6 = vpop.eup %2723 }
 0x6e3   :  { %v2726_v37 = vpop.eup %2725  ;;  %1887 = vadd.xlane.f32.xlu1 %v2724_v6 }
 0x6e4   :  { %1889 = vadd.xlane.f32.xlu0 %v2726_v37 }
 0x6e5   :  { %v2728_v17 = vpop.eup %2727 }
 0x6e7   :  { %1891 = vadd.xlane.f32.xlu1 %v2728_v17 }
 0x754   :  { %v1866_v33 = vpop.xlane.xlu0 %1865 }
 0x755   :  { %2729 = vlog2.f32 %v1866_v33 }
 0x758   :  { %v1862_v4 = vpop.xlane.xlu0 %1861  ;;  %v1868_v39 = vpop.xlane.xlu1 %1867 }
 0x759   :  { %2731 = vlog2.f32 %v1862_v4 }
 0x75a   :  { %2733 = vlog2.f32 %v1868_v39 }
 0x75c   :  { %v1864_v40 = vpop.xlane.xlu1 %1863 }
 0x75d   :  { %2735 = vlog2.f32 %v1864_v40  ;;  %v1874_v41 = vpop.xlane.xlu0 %1873 }
 0x75e   :  { %2737 = vlog2.f32 %v1874_v41 }
 0x75f   :  { %v2730_v43 = vpop.eup %2729 }
 0x760   :  { %v1898_v47 = vmul.f32 0.6931472, %v2730_v43  ;;  %v1876_v48 = vpop.xlane.xlu1 %1875 }
 0x761   :  { %2739 = vlog2.f32 %v1876_v48  ;;  %v1870_v49 = vpop.xlane.xlu0 %1869 }
 0x762   :  { %v1927_v51 = vsub.f32 %v3374_v31, %v1898_v47  ;;  %2741 = vlog2.f32 %v1870_v49 }
 0x763   :  { %v2732_v10 = vpop.eup %2731 }
 0x764   :  { %v2734_v11 = vpop.eup %2733  ;;  %1943 = vst [vmem:[#allocation16 + $0x10] sm:$0xff] %v1927_v51  ;;  %v1894_v14 = vmul.f32 0.6931472, %v2732_v10  ;;  %v1872_v15 = vpop.xlane.xlu1 %1871 }
 0x765   :  { %v1900_v54 = vmul.f32 0.6931472, %v2734_v11  ;;  %2743 = vlog2.f32 %v1872_v15  ;;  %v1882_v19 = vpop.xlane.xlu0 %1881 }
 0x766   :  { %v1925_v22 = vsub.f32 %v3376_v38, %v1894_v14  ;;  %2745 = vlog2.f32 %v1882_v19 }
 0x767   :  { %v2736_v55 = vpop.eup %2735  ;;  %v1928_v56 = vsub.f32 %v3380_v42, %v1900_v54 }
 0x768   :  { %v2738_v58 = vpop.eup %2737  ;;  %1941 = vst [vmem:[#allocation16] sm:$0xff] %v1925_v22  ;;  %v1896_v61 = vmul.f32 0.6931472, %v2736_v55  ;;  %v1884_v63 = vpop.xlane.xlu1 %1883 }
 0x769   :  { %1944 = vst [vmem:[#allocation16 + $0x18] sm:$0xff] %v1928_v56  ;;  %v1906_v31 = vmul.f32 0.6931472, %v2738_v58  ;;  %2747 = vlog2.f32 %v1884_v63  ;;  %v1878_v0 = vpop.xlane.xlu0 %1877 }
 0x76a   :  { %v1926_v9 = vsub.f32 %v3382_v44, %v1896_v61  ;;  %2749 = vlog2.f32 %v1878_v0 }
 0x76b   :  { %v2740_v13 = vpop.eup %2739  ;;  %v1931_v16 = vsub.f32 %v3386_v50, %v1906_v31 }
 0x76c   :  { %v2742_v2 = vpop.eup %2741  ;;  %1942 = vst [vmem:[#allocation16 + $0x8] sm:$0xff] %v1926_v9  ;;  %v1908_v38 = vmul.f32 0.6931472, %v2740_v13  ;;  %v1880_v3 = vpop.xlane.xlu1 %1879 }
 0x76d   :  { %1947 = vst [vmem:[#allocation16 + $0x30] sm:$0xff] %v1931_v16  ;;  %v1902_v42 = vmul.f32 0.6931472, %v2742_v2  ;;  %2751 = vlog2.f32 %v1880_v3  ;;  %v1886_v5 = vpop.xlane.xlu0 %1885 }
 0x76e   :  { %v1932_v7 = vsub.f32 %v3388_v52, %v1908_v38  ;;  %2753 = vlog2.f32 %v1886_v5 }
 0x76f   :  { %v2744_v20 = vpop.eup %2743  ;;  %v1929_v21 = vsub.f32 %v3392_v53, %v1902_v42 }
 0x770   :  { %v2746_v23 = vpop.eup %2745  ;;  %1948 = vst [vmem:[#allocation16 + $0x38] sm:$0xff] %v1932_v7  ;;  %v1904_v44 = vmul.f32 0.6931472, %v2744_v20  ;;  %v1888_v24 = vpop.xlane.xlu1 %1887 }
 0x771   :  { %1945 = vst [vmem:[#allocation16 + $0x20] sm:$0xff] %v1929_v21  ;;  %v1914_v50 = vmul.f32 0.6931472, %v2746_v23  ;;  %2755 = vlog2.f32 %v1888_v24  ;;  %v1890_v26 = vpop.xlane.xlu0 %1889 }
 0x772   :  { %v1930_v27 = vsub.f32 %v3394_v18, %v1904_v44  ;;  %2757 = vlog2.f32 %v1890_v26 }
 0x773   :  { %v2748_v29 = vpop.eup %2747  ;;  %v1935_v30 = vsub.f32 %v3398_v57, %v1914_v50 }
 0x774   :  { %v2750_v34 = vpop.eup %2749  ;;  %1946 = vst [vmem:[#allocation16 + $0x28] sm:$0xff] %v1930_v27  ;;  %v1916_v52 = vmul.f32 0.6931472, %v2748_v29  ;;  %v1892_v46 = vpop.xlane.xlu1 %1891 }
 0x775   :  { %1951 = vst [vmem:[#allocation16 + $0x50] sm:$0xff] %v1935_v30  ;;  %v1910_v53 = vmul.f32 0.6931472, %v2750_v34  ;;  %2759 = vlog2.f32 %v1892_v46 }
 0x776   :  { %v1936_v35 = vsub.f32 %v3400_v62, %v1916_v52 }
 0x777   :  { %v2752_v36 = vpop.eup %2751  ;;  %v1933_v45 = vsub.f32 %v3405_v12, %v1910_v53 }
 0x778   :  { %v2754_v60 = vpop.eup %2753  ;;  %1952 = vst [vmem:[#allocation16 + $0x58] sm:$0xff] %v1936_v35  ;;  %v1912_v59 = vmul.f32 0.6931472, %v2752_v36 }
 0x779   :  { %1949 = vst [vmem:[#allocation16 + $0x40] sm:$0xff] %v1933_v45  ;;  %v1918_v18 = vmul.f32 0.6931472, %v2754_v60 }
 0x77a   :  { %v1934_v6 = vsub.f32 %v3408_v1, %v1912_v59 }
 0x77b   :  { %v2756_v57 = vpop.eup %2755  ;;  %v1937_v37 = vsub.f32 %v3413_v8, %v1918_v18 }
 0x77c   :  { %v2758_v17 = vpop.eup %2757  ;;  %1950 = vst [vmem:[#allocation16 + $0x48] sm:$0xff] %v1934_v6  ;;  %v1920_v33 = vmul.f32 0.6931472, %v2756_v57 }
 0x77d   :  { %1953 = vst [vmem:[#allocation16 + $0x60] sm:$0xff] %v1937_v37  ;;  %v1922_v4 = vmul.f32 0.6931472, %v2758_v17 }
 0x77e   :  { %v1938_v62 = vsub.f32 %v3417_v25, %v1920_v33 }
 0x77f   :  { %v2760_v39 = vpop.eup %2759  ;;  %v1939_v12 = vsub.f32 %v3421_v28, %v1922_v4 }
 0x780   :  { %1954 = vst [vmem:[#allocation16 + $0x68] sm:$0xff] %v1938_v62  ;;  %v1924_v40 = vmul.f32 0.6931472, %v2760_v39 }
 0x781   :  { %1955 = vst [vmem:[#allocation16 + $0x70] sm:$0xff] %v1939_v12 }
 0x782   :  { %v1940_v1 = vsub.f32 %v3425_v32, %v1924_v40 }
 0x784   :  { %1956 = vst [vmem:[#allocation16 + $0x78] sm:$0xff] %v1940_v1 }
 0x785   :  { %2948 = shalt.err (!%p2945_p12)
}
 0x786   :  { %s2949_s30 = scalar_lea.hbm %s3466_s10, 2048 }
 0x787   :  { %p2950_p13 = scmp.ne.s32.totalorder %s3466_s10, %s2949_s30  ;;  %p2953_p0 = scmp.lt.u32.totalorder %s2949_s30, %s3466_s10 }
 0x789   :  { %p2955_p1 = pnand %p2953_p0, %p2950_p13 }
 0x78b   :  { %2958 = shalt.err (!%p2955_p1)
}
 0x78c   :  { %s2982_s13 = smov 128   ;;  %s2983_s0 = smov 8  }
 0x78d   :  { %1968 = dma.vmem_to_hbm [thread:$0]  %s1963_s23, 2048, %s3466_s10, [#allocation4], %s2982_s13, %s2982_s13, %s2983_s0  }
 0x78e   :  { %2969 = dma.done.wait [#allocation4], 2048  }
 0x78f   :  { %2970 = vsyncadd [#allocation4], 4294965248 }
 0x790   :  { %1972 = vsyncpa [#allocation3], 1 }
 0x791   :  { %1973 = vsyncpa [#allocation6], 1 }
 0x792   :  { %1974 = vsyncpa [#allocation9], 1 }
 0x793   :  { %1975 = vsyncpa [#allocation12], 1 }
 0x794   :  { %1976 = vsyncpa [#allocation15], 1 }
 0x795   :  { %1977 = vsyncpa [#allocation4], 1 }

</bundles_post_ra>
